<compile_context>
chip_gen: v6e
topology: v6e:2x2x1
jax: 0.10.0
libtpu: 0.0.40
codegen_flags: <defaults>
</compile_context>

<pallas_src>
import functools

import jax
import jax.numpy as jnp
from jax.experimental import pallas as pl
from jax.experimental.pallas import tpu as pltpu


D_IN, D_HID, D_MID, D_OUT = 3, 128, 64, 1


def _sdf_conf_kernel(
    xT_ref,                  # (3, TN)         point coords, feature-major
    w0T_ref, b0_ref,         # (128, 3), (128, 1)    fourier layer (transposed)
    w1T_ref, b1_ref,         # (128, 128), (128, 1)  fused [sdf|conf] hidden layer
    w2_ref,                  # (64, 2)               fused [sdf|conf] head weights
    b2_ref,                  # (2,) SMEM             head biases (scalars)
    out_ref,                 # (2, TN)               row 0 = sdf, row 1 = conf
):
    xT = xT_ref[...].astype(jnp.float32)     # (3, TN)
    w0T = w0T_ref[...]                       # (128, 3)

    # --- fourier layer + relu on the VPU (K=3 would waste a full MXU pass) ---
    h = (w0T[:, 0:1] * xT[0:1, :]
         + w0T[:, 1:2] * xT[1:2, :]
         + w0T[:, 2:3] * xT[2:3, :]
         + b0_ref[...])                      # (128, TN)
    h = jnp.maximum(h, 0.0)

    # --- fused hidden projection: one 128-wide f32 MXU pass for both branches ---
    sc = jnp.dot(w1T_ref[...], h, preferred_element_type=jnp.float32) + b1_ref[...]

    w2 = w2_ref[...]                         # (64, 2)

    # --- sdf branch first: consume & store it so its live range closes before
    #     the confidence branch is produced (helps v5e's single vst slot). ---
    s = jnp.maximum(sc[:D_MID, :], 0.0)                                   # (64, TN)
    sdf = jnp.sum(s * w2[:, 0:1], axis=0, keepdims=True) + b2_ref[0]      # (1, TN)
    out_ref[0:1, :] = sdf.astype(out_ref.dtype)

    # --- confidence branch ---
    c = jnp.tanh(sc[D_MID:, :])                                           # (64, TN)
    conf = jnp.tanh(jnp.sum(c * w2[:, 1:2], axis=0, keepdims=True) + b2_ref[1])
    out_ref[1:2, :] = conf.astype(out_ref.dtype)


def _const_spec(shape):
    # Whole-array weight/bias block, independent of the grid index.
    return pl.BlockSpec(shape, lambda i, _s=len(shape): (0,) * _s)


def _round_up(a, m):
    return ((a + m - 1) // m) * m


@functools.partial(jax.jit, static_argnames=("tile_n",))
def sdf_confidence_forward(x, params, *, tile_n=8192):
    """x: (N, 3) float32.  Returns (sdf (N,1), conf (N,1)), float32."""
    n = x.shape[0]
    (w0, b0, w1s, b1s, w2s, b2s, w1c, b1c, w2c, b2c) = params

    # --- batch-tile selection (all static at trace time) ---------------------
    # Clamp for small batches so a 300-point call doesn't pad to an 8192-wide
    # tile; keep >= 2 grid steps when possible so both v7x TensorCores get work
    # on the "parallel" axis.
    tile = max(512, min(tile_n, _round_up(n, 512)))
    if n >= 2 * 512:
        tile = min(tile, _round_up(-(-n // 2), 512))
    n_pad = _round_up(n, tile)
    grid = (n_pad // tile,)

    # Explicit VMEM budget: live intermediates (h, sc, s, c in f32) are
    # ~1.5 KB/point; keep >= 32 MiB (v5e default scoped limit is 16 MiB) and
    # cap at 48 MiB so the kernel also fits v7x's 64 MiB-per-TC VMEM.
    vmem_limit = int(min(48 << 20, max(32 << 20, tile * 2048 + (8 << 20))))

    # Ragged batch: pad N up to a multiple of tile, slice the result back.
    if n_pad != n:
        x = jnp.pad(x, ((0, n_pad - n), (0, 0)))
    xT = x.T                                                   # (3, n_pad)
    # TODO(synk): accept a feature-major (3, N) input directly to skip this
    # one wrapper-side transpose (~2-5% fixed tax) when the caller holds SoA.

    # One-time (tiny) parameter re-layout done in XLA outside the kernel.
    w0T = w0.T                                                 # (128, 3)
    b0c = b0.reshape(D_HID, 1)                                 # (128, 1)
    w1T = jnp.concatenate([w1s, w1c], axis=1).T                # (128, 128)
    b1f = jnp.concatenate([b1s, b1c], axis=1).reshape(2 * D_MID, 1)  # (128, 1)
    w2f = jnp.concatenate([w2s, w2c], axis=1)                  # (64, 2)
    b2f = jnp.concatenate([b2s.reshape(1), b2c.reshape(1)])    # (2,)  -> SMEM

    in_specs = [
        pl.BlockSpec((D_IN, tile), lambda i: (0, i)),          # xT tile
        _const_spec((D_HID, D_IN)),  _const_spec((D_HID, 1)),  # w0T, b0
        _const_spec((D_HID, D_HID)), _const_spec((D_HID, 1)),  # w1T fused, b1 fused
        _const_spec((D_MID, 2)),                               # w2 fused heads
        pl.BlockSpec(memory_space=pltpu.MemorySpace.SMEM),     # b2 scalars
    ]
    out_specs = pl.BlockSpec((2, tile), lambda i: (0, i))      # stacked lane-dense slab
    out_shape = jax.ShapeDtypeStruct((2, n_pad), jnp.float32)

    both = pl.pallas_call(
        _sdf_conf_kernel,
        grid=grid,
        in_specs=in_specs,
        out_specs=out_specs,
        out_shape=out_shape,
        compiler_params=pltpu.CompilerParams(
            dimension_semantics=("parallel",),
            vmem_limit_bytes=vmem_limit,
        ),
    )(xT, w0T, b0c, w1T, b1f, w2f, b2f)

    # Back to the PyTorch (N, 1) layout with a single relayout for both outputs.
    outT = both.T                                              # (n_pad, 2)
    sdf = outT[:n, 0:1]
    conf = outT[:n, 1:2]
    return sdf, conf


def init_params(key):
    """Deterministic init mimicking PyTorch nn.Linear default (U(-1/sqrt(fan_in), ..))."""
    def linear(k, fan_in, fan_out):
        kw, kb = jax.random.split(k)
        bound = 1.0 / jnp.sqrt(fan_in)
        w = jax.random.uniform(kw, (fan_in, fan_out), jnp.float32, -bound, bound)
        b = jax.random.uniform(kb, (1, fan_out), jnp.float32, -bound, bound)
        return w, b

    k0, k1, k2, k3, k4 = jax.random.split(key, 5)
    w0, b0 = linear(k0, D_IN, D_HID)      # fourier_layer
    w1s, b1s = linear(k1, D_HID, D_MID)   # sdf_model[0]
    w2s, b2s = linear(k2, D_MID, D_OUT)   # sdf_model[2]
    w1c, b1c = linear(k3, D_HID, D_MID)   # confidence_model[0]
    w2c, b2c = linear(k4, D_MID, D_OUT)   # confidence_model[2]
    return (w0, b0, w1s, b1s, w2s, b2s, w1c, b1c, w2c, b2c)


def reference_forward(x, params):
    (w0, b0, w1s, b1s, w2s, b2s, w1c, b1c, w2c, b2c) = params
    with jax.default_matmul_precision("highest"):
        h = jax.nn.relu(x @ w0 + b0)
        sdf = jax.nn.relu(h @ w1s + b1s) @ w2s + b2s
        conf = jnp.tanh(jnp.tanh(h @ w1c + b1c) @ w2c + b2c)
    return sdf, conf


if __name__ == "__main__":
    key = jax.random.PRNGKey(0)
    kx, kp = jax.random.split(key)
    params = init_params(kp)

    # Small ragged batch: exercises the small-batch tile clamp + padding path.
    n_small = 300
    x_small = jax.random.normal(kx, (n_small, D_IN), jnp.float32)
    sdf_s, conf_s = jax.block_until_ready(sdf_confidence_forward(x_small, params))

    # Larger batch: exercises the multi-step "parallel" grid (2 steps of 1024).
    n_big = 1500
    x_big = jax.random.normal(jax.random.fold_in(kx, 1), (n_big, D_IN), jnp.float32)
    sdf_b, conf_b = jax.block_until_ready(sdf_confidence_forward(x_big, params))

    # Correctness vs. pure-JAX highest-precision reference.
    # Tolerance set consciously at 2e-4: the in-kernel matmul is f32 MXU passes.
    tol = dict(atol=2e-4, rtol=2e-4)
    sdf_ref_s, conf_ref_s = reference_forward(x_small, params)
    sdf_ref_b, conf_ref_b = reference_forward(x_big, params)

    assert sdf_s.shape == (n_small, 1) and conf_s.shape == (n_small, 1)
    assert sdf_b.shape == (n_big, 1) and conf_b.shape == (n_big, 1)
    assert jnp.allclose(sdf_s, sdf_ref_s, **tol)
    assert jnp.allclose(conf_s, conf_ref_s, **tol)
    assert jnp.allclose(sdf_b, sdf_ref_b, **tol)
    assert jnp.allclose(conf_b, conf_ref_b, **tol)

    print("KERNEL_OK")
</pallas_src>

<mosaic_0001>
module attributes {stable_mosaic.version = 11 : i64} {
  func.func @_sdf_conf_kernel(%arg0: i32, %arg1: memref<3x512xf32, #tpu.memory_space<vmem>>, %arg2: memref<128x3xf32, #tpu.memory_space<vmem>>, %arg3: memref<128x1xf32, #tpu.memory_space<vmem>>, %arg4: memref<128x128xf32, #tpu.memory_space<vmem>>, %arg5: memref<128x1xf32, #tpu.memory_space<vmem>>, %arg6: memref<64x2xf32, #tpu.memory_space<vmem>>, %arg7: memref<2xf32, #tpu.memory_space<smem>>, %arg8: memref<2x512xf32, #tpu.memory_space<vmem>>) attributes {dimension_semantics = [#tpu.dimension_semantics<parallel>], iteration_bounds = array<i64: 1>, scalar_prefetch = 0 : i64, scratch_operands = 0 : i64, tpu.core_type = #tpu.core_type<tc>, window_params = [{transform_indices = @transform_0, window_bounds = array<i64: 3, 512>}, {pipeline_mode = #tpu.pipeline_mode<synchronous>, transform_indices = @transform_1, window_bounds = array<i64: 128, 3>}, {pipeline_mode = #tpu.pipeline_mode<synchronous>, transform_indices = @transform_2, window_bounds = array<i64: 128, 1>}, {pipeline_mode = #tpu.pipeline_mode<synchronous>, transform_indices = @transform_3, window_bounds = array<i64: 128, 128>}, {pipeline_mode = #tpu.pipeline_mode<synchronous>, transform_indices = @transform_4, window_bounds = array<i64: 128, 1>}, {pipeline_mode = #tpu.pipeline_mode<synchronous>, transform_indices = @transform_5, window_bounds = array<i64: 64, 2>}, {transform_indices = @transform_6, window_bounds = array<i64: 2>}, {transform_indices = @transform_7, window_bounds = array<i64: 2, 512>}]} {
    %c0 = arith.constant 0 : index
    %c0_0 = arith.constant 0 : index
    %0 = vector.load %arg1[%c0, %c0_0] : memref<3x512xf32, #tpu.memory_space<vmem>>, vector<3x512xf32>
    %c0_1 = arith.constant 0 : index
    %c0_2 = arith.constant 0 : index
    %1 = vector.load %arg2[%c0_1, %c0_2] : memref<128x3xf32, #tpu.memory_space<vmem>>, vector<128x3xf32>
    %2 = vector.extract_strided_slice %1 {offsets = [0, 0], sizes = [128, 1], strides = [1, 1]} : vector<128x3xf32> to vector<128x1xf32>
    %3 = vector.extract_strided_slice %0 {offsets = [0, 0], sizes = [1, 512], strides = [1, 1]} : vector<3x512xf32> to vector<1x512xf32>
    %4 = vector.broadcast %2 : vector<128x1xf32> to vector<128x512xf32>
    %5 = vector.broadcast %3 : vector<1x512xf32> to vector<128x512xf32>
    %6 = arith.mulf %4, %5 : vector<128x512xf32>
    %7 = vector.extract_strided_slice %1 {offsets = [0, 1], sizes = [128, 1], strides = [1, 1]} : vector<128x3xf32> to vector<128x1xf32>
    %8 = vector.extract_strided_slice %0 {offsets = [1, 0], sizes = [1, 512], strides = [1, 1]} : vector<3x512xf32> to vector<1x512xf32>
    %9 = vector.broadcast %7 : vector<128x1xf32> to vector<128x512xf32>
    %10 = vector.broadcast %8 : vector<1x512xf32> to vector<128x512xf32>
    %11 = arith.mulf %9, %10 : vector<128x512xf32>
    %12 = arith.addf %6, %11 : vector<128x512xf32>
    %13 = vector.extract_strided_slice %1 {offsets = [0, 2], sizes = [128, 1], strides = [1, 1]} : vector<128x3xf32> to vector<128x1xf32>
    %14 = vector.extract_strided_slice %0 {offsets = [2, 0], sizes = [1, 512], strides = [1, 1]} : vector<3x512xf32> to vector<1x512xf32>
    %15 = vector.broadcast %13 : vector<128x1xf32> to vector<128x512xf32>
    %16 = vector.broadcast %14 : vector<1x512xf32> to vector<128x512xf32>
    %17 = arith.mulf %15, %16 : vector<128x512xf32>
    %18 = arith.addf %12, %17 : vector<128x512xf32>
    %c0_3 = arith.constant 0 : index
    %c0_4 = arith.constant 0 : index
    %19 = vector.load %arg3[%c0_3, %c0_4] : memref<128x1xf32, #tpu.memory_space<vmem>>, vector<128x1xf32>
    %20 = vector.broadcast %19 : vector<128x1xf32> to vector<128x512xf32>
    %21 = arith.addf %18, %20 : vector<128x512xf32>
    %cst = arith.constant 0.000000e+00 : f32
    %22 = vector.broadcast %cst : f32 to vector<128x512xf32>
    %23 = arith.maximumf %21, %22 : vector<128x512xf32>
    %c0_5 = arith.constant 0 : index
    %c0_6 = arith.constant 0 : index
    %24 = vector.load %arg4[%c0_5, %c0_6] : memref<128x128xf32, #tpu.memory_space<vmem>>, vector<128x128xf32>
    %cst_7 = arith.constant dense<0.000000e+00> : vector<128x512xf32>
    %25 = tpu.matmul %24, %23, %cst_7 {dimension_numbers = #tpu.dot_dimension_numbers<[1], [0], [0], [1], [0, 0, 1, 1], [], []>} : vector<128x128xf32>, vector<128x512xf32>, vector<128x512xf32> -> vector<128x512xf32>
    %c0_8 = arith.constant 0 : index
    %c0_9 = arith.constant 0 : index
    %26 = vector.load %arg5[%c0_8, %c0_9] : memref<128x1xf32, #tpu.memory_space<vmem>>, vector<128x1xf32>
    %27 = vector.broadcast %26 : vector<128x1xf32> to vector<128x512xf32>
    %28 = arith.addf %25, %27 : vector<128x512xf32>
    %c0_10 = arith.constant 0 : index
    %c0_11 = arith.constant 0 : index
    %29 = vector.load %arg6[%c0_10, %c0_11] : memref<64x2xf32, #tpu.memory_space<vmem>>, vector<64x2xf32>
    %30 = vector.extract_strided_slice %28 {offsets = [0, 0], sizes = [64, 512], strides = [1, 1]} : vector<128x512xf32> to vector<64x512xf32>
    %cst_12 = arith.constant 0.000000e+00 : f32
    %31 = vector.broadcast %cst_12 : f32 to vector<64x512xf32>
    %32 = arith.maximumf %30, %31 : vector<64x512xf32>
    %33 = vector.extract_strided_slice %29 {offsets = [0, 0], sizes = [64, 1], strides = [1, 1]} : vector<64x2xf32> to vector<64x1xf32>
    %34 = vector.broadcast %33 : vector<64x1xf32> to vector<64x512xf32>
    %35 = arith.mulf %32, %34 : vector<64x512xf32>
    %cst_13 = arith.constant dense<0.000000e+00> : vector<512xf32>
    %36 = vector.multi_reduction <add>, %35, %cst_13 [0] : vector<64x512xf32> to vector<512xf32>
    %37 = vector.shape_cast %36 : vector<512xf32> to vector<1x512xf32>
    %c0_14 = arith.constant 0 : index
    %38 = memref.load %arg7[%c0_14] : memref<2xf32, #tpu.memory_space<smem>>
    %39 = vector.broadcast %38 : f32 to vector<1x512xf32>
    %40 = arith.addf %37, %39 : vector<1x512xf32>
    %c0_15 = arith.constant 0 : index
    %c0_16 = arith.constant 0 : index
    %41 = vector.load %arg8[%c0_15, %c0_16] : memref<2x512xf32, #tpu.memory_space<vmem>>, vector<1x512xf32>
    tpu.vector_store %arg8[%c0_15, %c0_16], %40 {strides = array<i32>} : memref<2x512xf32, #tpu.memory_space<vmem>>, vector<1x512xf32>,
    %42 = vector.extract_strided_slice %28 {offsets = [64, 0], sizes = [64, 512], strides = [1, 1]} : vector<128x512xf32> to vector<64x512xf32>
    %43 = math.tanh %42 : vector<64x512xf32>
    %44 = vector.extract_strided_slice %29 {offsets = [0, 1], sizes = [64, 1], strides = [1, 1]} : vector<64x2xf32> to vector<64x1xf32>
    %45 = vector.broadcast %44 : vector<64x1xf32> to vector<64x512xf32>
    %46 = arith.mulf %43, %45 : vector<64x512xf32>
    %cst_17 = arith.constant dense<0.000000e+00> : vector<512xf32>
    %47 = vector.multi_reduction <add>, %46, %cst_17 [0] : vector<64x512xf32> to vector<512xf32>
    %48 = vector.shape_cast %47 : vector<512xf32> to vector<1x512xf32>
    %c1 = arith.constant 1 : index
    %49 = memref.load %arg7[%c1] : memref<2xf32, #tpu.memory_space<smem>>
    %50 = vector.broadcast %49 : f32 to vector<1x512xf32>
    %51 = arith.addf %48, %50 : vector<1x512xf32>
    %52 = math.tanh %51 : vector<1x512xf32>
    %c1_18 = arith.constant 1 : index
    %c0_19 = arith.constant 0 : index
    %53 = vector.load %arg8[%c1_18, %c0_19] : memref<2x512xf32, #tpu.memory_space<vmem>>, vector<1x512xf32>
    tpu.vector_store %arg8[%c1_18, %c0_19], %52 {strides = array<i32>} : memref<2x512xf32, #tpu.memory_space<vmem>>, vector<1x512xf32>,
    return
  }
  func.func @transform_0(%arg0: i32) -> (i32, i32) {
    %c0_i32 = arith.constant 0 : i32
    %c0_i32_0 = arith.constant 0 : i32
    return %c0_i32, %arg0 : i32, i32
  }
  func.func @transform_1(%arg0: i32) -> (i32, i32) {
    %c0_i32 = arith.constant 0 : i32
    %c0_i32_0 = arith.constant 0 : i32
    %c0_i32_1 = arith.constant 0 : i32
    return %c0_i32, %c0_i32_0 : i32, i32
  }
  func.func @transform_2(%arg0: i32) -> (i32, i32) {
    %c0_i32 = arith.constant 0 : i32
    %c0_i32_0 = arith.constant 0 : i32
    %c0_i32_1 = arith.constant 0 : i32
    return %c0_i32, %c0_i32_0 : i32, i32
  }
  func.func @transform_3(%arg0: i32) -> (i32, i32) {
    %c0_i32 = arith.constant 0 : i32
    %c0_i32_0 = arith.constant 0 : i32
    %c0_i32_1 = arith.constant 0 : i32
    return %c0_i32, %c0_i32_0 : i32, i32
  }
  func.func @transform_4(%arg0: i32) -> (i32, i32) {
    %c0_i32 = arith.constant 0 : i32
    %c0_i32_0 = arith.constant 0 : i32
    %c0_i32_1 = arith.constant 0 : i32
    return %c0_i32, %c0_i32_0 : i32, i32
  }
  func.func @transform_5(%arg0: i32) -> (i32, i32) {
    %c0_i32 = arith.constant 0 : i32
    %c0_i32_0 = arith.constant 0 : i32
    %c0_i32_1 = arith.constant 0 : i32
    return %c0_i32, %c0_i32_0 : i32, i32
  }
  func.func @transform_6(%arg0: i32) -> i32 {
    %c0_i32 = arith.constant 0 : i32
    %c0_i32_0 = arith.constant 0 : i32
    return %c0_i32 : i32
  }
  func.func @transform_7(%arg0: i32) -> (i32, i32) {
    %c0_i32 = arith.constant 0 : i32
    %c0_i32_0 = arith.constant 0 : i32
    return %c0_i32, %arg0 : i32, i32
  }
}

</mosaic_0001>

<bundles_post_ra>
// kernel: sdf_confidence_forward.1
= control target key start
LH: loop header
LB: loop body
LE: loop exit
PB: predicated region body
PF: predicated region fallthrough
CT: control target
= control target key end

     0   :  { %12 = vsyncpa [#allocation3], 0  ;;  %s2927_s0 = inlined_call_operand.vmem [shape: f32[3,512], index: 0, kind: input, shape index: {}]   ;;  %s2928_s1 = inlined_call_operand.vmem [shape: f32[128,3], index: 1, kind: input, shape index: {}]   ;;  %s2929_s2 = inlined_call_operand.vmem [shape: f32[128,1], index: 2, kind: input, shape index: {}]   ;;  %s2930_s3 = inlined_call_operand.vmem [shape: f32[128,128], index: 3, kind: input, shape index: {}]   ;;  %s2931_s4 = inlined_call_operand.vmem [shape: f32[128,1], index: 4, kind: input, shape index: {}]   ;;  %s2932_s5 = inlined_call_operand.vmem [shape: f32[64,2], index: 5, kind: input, shape index: {}]   ;;  %s2933_s6 = inlined_call_operand.vmem [shape: f32[2], index: 6, kind: input, shape index: {}]   ;;  %s2934_s7 = inlined_call_operand.vmem [shape: f32[2,512], index: 7, kind: output, shape index: {}]  }
   0x1   :  { %s31_s26 = sshll.u32 %s2933_s6, 4  ;;  %s32_s26 = int_to_ptr.vmem [resolvable:$true] %s31_s26 }
   0x2   :  { %s1878_s27 = scalar_lea.vmem %s32_s26, 16  ;;  %p1883_p1 = scmp.lt.s32.totalorder %s32_s26, %s32_s26 }
   0x3   :  { %p1879_p0 = scmp.ne.s32.totalorder %s32_s26, %s1878_s27  ;;  %p1884_p2 = scmp.lt.s32.totalorder %s1878_s27, %s1878_s27 }
   0x5   :  { %p1885_p3 = por %p1884_p2, %p1883_p1 }
   0x7   :  { %p1886_p4 = pnand %p1885_p3, %p1879_p0 }
   0x9   :  { %1889 = shalt.err (!%p1886_p4)
}
   0xa   :  { %s1892_s28 = smov [#allocation2]  }
   0xb   :  { %34 = dma.vmem_to_smem %s32_s26, 16, %s1892_s28, [#allocation3]  }
   0xc   :  { %1890 = dma.done.wait [#allocation3], 16  }
   0xd   :  { %1891 = vsyncadd [#allocation3], 4294967280 }
   0xe   :  { %38 = sfence }
   0xf   :  { %v55_v0 = vld [vmem:[%s2928_s1 + $0x70] sm:$0xff]  ;;  %v54_v1 = vld [vmem:[%s2928_s1 + $0x68] sm:$0xff]  ;;  %v2936_v2 = vmov 2   ;;  %v2941_v3 = vmov 0   ;;  %v56_v4 = vld [vmem:[%s2928_s1 + $0x78] sm:$0xff]  ;;  %v2937_v5 = vmov 1   ;;  %v2935_v38 = vlaneseq }
  0x10   :  { %1765 = vset.pattern.permute.xlu0 %v2936_v2  ;;  %1759 = vset.pattern.permute.xlu1 %v2941_v3  ;;  %v52_v6 = vld [vmem:[%s2928_s1 + $0x58] sm:$0xff]  ;;  %v50_v7 = vld [vmem:[%s2928_s1 + $0x48] sm:$0xff]  ;;  %v53_v10 = vld [vmem:[%s2928_s1 + $0x60] sm:$0xff]  ;;  %s1751_s20 = sld [smem:[#allocation2 + $0x1]] }
  0x11   :  { %129 = vperm.xlu1 %1759, %v55_v0   ;;  %520 = vperm.xlu0 %1765, %v54_v1   ;;  %v1965_v8 = vld [vmem:[%s2928_s1 + $0x38] sm:$0xff]  ;;  %v1971_v9 = vld [vmem:[%s2928_s1 + $0x28] sm:$0xff]  ;;  %v709_v14 = vld [vmem:[%s2929_s2 + $0x70] sm:$0xff]  ;;  %v2100_v41 = vshrl.u32 %v2935_v38, 7 }
  0x12   :  { %v1981_v11 = vld [vmem:[%s2928_s1 + $0x18] sm:$0xff]  ;;  %v1988_v12 = vld [vmem:[%s2928_s1 + $0x8] sm:$0xff]  ;;  %v51_v15 = vld [vmem:[%s2928_s1 + $0x50] sm:$0xff] }
  0x13   :  { %v710_v13 = vld [vmem:[%s2929_s2 + $0x78] sm:$0xff]  ;;  %v708_v16 = vld [vmem:[%s2929_s2 + $0x68] sm:$0xff]  ;;  %v49_v17 = vld [vmem:[%s2928_s1 + $0x40] sm:$0xff]  ;;  %2949 = vst [vmem:[#allocation5_spill] sm:$0xff] %v2100_v41  ;;  %v141_v44 = vsub.s32 0, %v2100_v41  ;;  %v145_v46 = vsub.s32 4, %v2100_v41 }
  0x14   :  { %v706_v18 = vld [vmem:[%s2929_s2 + $0x58] sm:$0xff]  ;;  %v47_v19 = vld [vmem:[%s2928_s1 + $0x30] sm:$0xff]  ;;  %v704_v20 = vld [vmem:[%s2929_s2 + $0x48] sm:$0xff]  ;;  %v305_v48 = vsub.s32 1, %v2100_v41  ;;  %v309_v49 = vsub.s32 5, %v2100_v41  ;;  %v533_v51 = vsub.s32 2, %v2100_v41 }
  0x15   :  { %1760 = vset.pattern.permute.xlu1 %v2937_v5  ;;  %1766 = vset.pattern.permute.xlu0 %v2937_v5  ;;  %v707_v21 = vld [vmem:[%s2929_s2 + $0x60] sm:$0xff]  ;;  %v702_v23 = vld [vmem:[%s2929_s2 + $0x38] sm:$0xff]  ;;  %v2037_v24 = vld [vmem:[%s2928_s1 + $0x10] sm:$0xff]  ;;  %v537_v54 = vsub.s32 6, %v2100_v41 }
  0x16   :  { %296 = vperm.xlu1 %1760, %v55_v0   ;;  %300 = vperm.xlu0 %1766, %v56_v4   ;;  %v45_v22 = vld [vmem:[%s2928_s1 + $0x20] sm:$0xff]  ;;  %v700_v25 = vld [vmem:[%s2929_s2 + $0x28] sm:$0xff]  ;;  %v698_v27 = vld [vmem:[%s2929_s2 + $0x18] sm:$0xff] }
  0x17   :  { %v2048_v26 = vld [vmem:[%s2928_s1] sm:$0xff]  ;;  %v705_v28 = vld [vmem:[%s2929_s2 + $0x50] sm:$0xff]  ;;  %v40_v52 = vld [vmem:[%s2927_s0 + $0x8] sm:$0x77] }
  0x18   :  { %v697_v29 = vld [vmem:[%s2929_s2 + $0x10] sm:$0xff]  ;;  %v695_v30 = vld [vmem:[%s2929_s2] sm:$0xff]  ;;  %v318_v58 = vrot.slane %v40_v52, %v309_v49  ;;  %v150_v61 = vrot.slane %v40_v52, %v141_v44  ;;  %v154_v62 = vrot.slane %v40_v52, %v145_v46 }
  0x19   :  { %v703_v31 = vld [vmem:[%s2929_s2 + $0x40] sm:$0xff]  ;;  %v701_v43 = vld [vmem:[%s2929_s2 + $0x30] sm:$0xff] }
  0x1a   :  { %1761 = vset.pattern.permute.xlu1 %v2936_v2  ;;  %284 = vperm.xlu0 %1766, %v52_v6   ;;  %v39_v47 = vld [vmem:[%s2927_s0] sm:$0x77] }
  0x1b   :  { %528 = vperm.xlu1 %1761, %v56_v4   ;;  %v142_v53 = vrot.slane %v39_v47, %v141_v44  ;;  %v146_v55 = vrot.slane %v39_v47, %v145_v46  ;;  %v306_v56 = vrot.slane %v39_v47, %v305_v48  ;;  %v310_v57 = vrot.slane %v39_v47, %v309_v49 }
  0x1c   :  { %v534_v63 = vrot.slane %v39_v47, %v533_v51 }
  0x1e   :  { %276 = vperm.xlu0 %1766, %v50_v7  }
  0x1f   :  { %1762 = vset.pattern.permute.xlu1 %v2937_v5 }
  0x20   :  { %292 = vperm.xlu1 %1762, %v54_v1  }
  0x22   :  { %268 = vperm.xlu0 %1766, %v1965_v8  }
  0x24   :  { %1763 = vset.pattern.permute.xlu1 %v2936_v2 }
  0x25   :  { %524 = vperm.xlu1 %1763, %v55_v0   ;;  %v314_v0 = vrot.slane %v40_v52, %v305_v48 }
  0x26   :  { %260 = vperm.xlu0 %1766, %v1971_v9  }
  0x29   :  { %1764 = vset.pattern.permute.xlu1 %v2937_v5 }
  0x2a   :  { %288 = vperm.xlu1 %1764, %v53_v10   ;;  %252 = vperm.xlu0 %1766, %v1981_v11  }
  0x2e   :  { %1767 = vset.pattern.permute.xlu1 %v2941_v3  ;;  %244 = vperm.xlu0 %1766, %v1988_v12  }
  0x2f   :  { %788 = vperm.xlu1 %1767, %v710_v13   ;;  %v2138_v13 = vrot.slane %v318_v58, %v305_v48 }
  0x32   :  { %1793 = vset.pattern.permute.xlu0 %v2941_v3 }
  0x33   :  { %114 = vperm.xlu1 %1767, %v52_v6   ;;  %134 = vperm.xlu0 %1793, %v56_v4   ;;  %v538_v4 = vrot.slane %v39_v47, %v537_v54 }
  0x37   :  { %1768 = vset.pattern.permute.xlu1 %v2936_v2  ;;  %124 = vperm.xlu0 %1793, %v54_v1   ;;  %v2130_v1 = vrot.slane %v142_v53, %v141_v44 }
  0x38   :  { %516 = vperm.xlu1 %1768, %v53_v10  }
  0x3b   :  { %119 = vperm.xlu0 %1793, %v53_v10   ;;  %v2136_v10 = vrot.slane %v310_v57, %v305_v48 }
  0x3c   :  { %1769 = vset.pattern.permute.xlu1 %v2941_v3 }
  0x3d   :  { %783 = vperm.xlu1 %1769, %v709_v14  }
  0x3f   :  { %109 = vperm.xlu0 %1793, %v51_v15  }
  0x41   :  { %1770 = vset.pattern.permute.xlu1 %v2937_v5 }
  0x42   :  { %280 = vperm.xlu1 %1770, %v51_v15  }
  0x43   :  { %778 = vperm.xlu0 %1793, %v708_v16   ;;  %v2145_v16 = vrot.slane %v150_v61, %v141_v44 }
  0x46   :  { %1771 = vset.pattern.permute.xlu1 %v2936_v2 }
  0x47   :  { %512 = vperm.xlu1 %1771, %v52_v6   ;;  %99 = vperm.xlu0 %1793, %v49_v17   ;;  %v542_v6 = vrot.slane %v40_v52, %v533_v51 }
  0x4b   :  { %1772 = vset.pattern.permute.xlu1 %v2941_v3  ;;  %768 = vperm.xlu0 %1793, %v706_v18   ;;  %v2149_v18 = vrot.slane %v534_v63, %v533_v51 }
  0x4c   :  { %104 = vperm.xlu1 %1772, %v50_v7  }
  0x4f   :  { %89 = vperm.xlu0 %1793, %v47_v19  }
  0x50   :  { %1773 = vset.pattern.permute.xlu1 %v2936_v2 }
  0x51   :  { %508 = vperm.xlu1 %1773, %v51_v15  }
  0x53   :  { %758 = vperm.xlu0 %1793, %v704_v20  }
  0x55   :  { %1774 = vset.pattern.permute.xlu1 %v2941_v3 }
  0x56   :  { %773 = vperm.xlu1 %1774, %v707_v21   ;;  %v2156_v21 = vrot.slane %v538_v4, %v533_v51 }
  0x57   :  { %79 = vperm.xlu0 %1793, %v45_v22  }
  0x5a   :  { %1775 = vset.pattern.permute.xlu1 %v2937_v5 }
  0x5b   :  { %272 = vperm.xlu1 %1775, %v49_v17   ;;  %748 = vperm.xlu0 %1793, %v702_v23  }
  0x5f   :  { %1776 = vset.pattern.permute.xlu1 %v2936_v2  ;;  %69 = vperm.xlu0 %1793, %v2037_v24  }
  0x60   :  { %504 = vperm.xlu1 %1776, %v50_v7   ;;  %v546_v7 = vrot.slane %v40_v52, %v537_v54 }
  0x62   :  { %v2160_v23 = vrot.slane %v546_v7, %v533_v51 }
  0x63   :  { %738 = vperm.xlu0 %1793, %v700_v25  }
  0x64   :  { %1777 = vset.pattern.permute.xlu1 %v2941_v3 }
  0x65   :  { %94 = vperm.xlu1 %1777, %v1965_v8  }
  0x67   :  { %59 = vperm.xlu0 %1793, %v2048_v26  }
  0x69   :  { %1778 = vset.pattern.permute.xlu1 %v2936_v2 }
  0x6a   :  { %500 = vperm.xlu1 %1778, %v49_v17   ;;  %v2147_v17 = vrot.slane %v154_v62, %v141_v44 }
  0x6b   :  { %728 = vperm.xlu0 %1793, %v698_v27  }
  0x6e   :  { %1779 = vset.pattern.permute.xlu1 %v2941_v3 }
  0x6f   :  { %763 = vperm.xlu1 %1779, %v705_v28   ;;  %723 = vperm.xlu0 %1793, %v697_v29  }
  0x73   :  { %1780 = vset.pattern.permute.xlu1 %v2937_v5  ;;  %713 = vperm.xlu0 %1793, %v695_v30  }
  0x74   :  { %264 = vperm.xlu1 %1780, %v47_v19  }
  0x77   :  { %1800 = vset.pattern.permute.xlu0 %v2937_v5 }
  0x78   :  { %1781 = vset.pattern.permute.xlu1 %v2936_v2 }
  0x79   :  { %496 = vperm.xlu1 %1781, %v1965_v8   ;;  %v2132_v8 = vrot.slane %v146_v55, %v141_v44 }
  0x7d   :  { %1782 = vset.pattern.permute.xlu1 %v2941_v3 }
  0x7e   :  { %84 = vperm.xlu1 %1782, %v1971_v9  }
  0x82   :  { %1783 = vset.pattern.permute.xlu1 %v2936_v2 }
  0x83   :  { %492 = vperm.xlu1 %1783, %v47_v19   ;;  %v2151_v19 = vrot.slane %v314_v0, %v305_v48 }
  0x87   :  { %1784 = vset.pattern.permute.xlu1 %v2941_v3 }
  0x88   :  { %753 = vperm.xlu1 %1784, %v703_v31  }
  0x8c   :  { %v2077_v32 = vpop.permute.xlu1 %129  ;;  %1785 = vset.pattern.permute.xlu1 %v2937_v5  ;;  %v2080_v33 = vpop.permute.xlu0 %520 }
  0x8d   :  { %256 = vperm.xlu1 %1785, %v45_v22   ;;  %v231_v20 = vmul.f32 %v2130_v1, %v2077_v32  ;;  %v232_v25 = vmul.f32 %v2132_v8, %v2077_v32  ;;  %v233_v47 = vmul.f32 %v2145_v16, %v2077_v32  ;;  %v2186_v49 = vmul.f32 %v2156_v21, %v2080_v33 }
  0x91   :  { %v2082_v34 = vpop.permute.xlu1 %296  ;;  %1786 = vset.pattern.permute.xlu1 %v2936_v2  ;;  %v2085_v35 = vpop.permute.xlu0 %300 }
  0x92   :  { %488 = vperm.xlu1 %1786, %v1971_v9   ;;  %v2134_v9 = vrot.slane %v306_v56, %v305_v48  ;;  %v396_v28 = vmul.f32 %v2136_v10, %v2082_v34  ;;  %v400_v30 = vmul.f32 %v2136_v10, %v2085_v35  ;;  %v401_v31 = vmul.f32 %v2151_v19, %v2085_v35 }
  0x93   :  { %v234_v48 = vmul.f32 %v2147_v17, %v2077_v32  ;;  %v2198_v32 = vmul.f32 %v2160_v23, %v2080_v33 }
  0x94   :  { %v395_v27 = vmul.f32 %v2134_v9, %v2082_v34  ;;  %v399_v29 = vmul.f32 %v2134_v9, %v2085_v35  ;;  %v460_v55 = vadd.f32 %v396_v28, %v232_v25 }
  0x95   :  { %v2088_v36 = vpop.permute.xlu0 %284 }
  0x96   :  { %v2090_v37 = vpop.permute.xlu1 %528  ;;  %1787 = vset.pattern.permute.xlu1 %v2941_v3  ;;  %v459_v57 = vadd.f32 %v395_v27, %v231_v20 }
  0x97   :  { %74 = vperm.xlu1 %1787, %v1981_v11   ;;  %v628_v20 = vmul.f32 %v2156_v21, %v2090_v37  ;;  %v630_v25 = vmul.f32 %v2160_v23, %v2090_v37  ;;  %v627_v27 = vmul.f32 %v2149_v18, %v2090_v37 }
  0x99   :  { %v2094_v39 = vpop.permute.xlu0 %276 }
  0x9b   :  { %v2096_v40 = vpop.permute.xlu1 %292  ;;  %1788 = vset.pattern.permute.xlu1 %v2936_v2 }
  0x9c   :  { %484 = vperm.xlu1 %1788, %v45_v22   ;;  %v2158_v22 = vrot.slane %v542_v6, %v533_v51  ;;  %v397_v51 = vmul.f32 %v2151_v19, %v2082_v34 }
  0x9d   :  { %v2102_v42 = vpop.permute.xlu0 %268 }
  0x9e   :  { %v629_v28 = vmul.f32 %v2158_v22, %v2090_v37  ;;  %v699_v37 = vld [vmem:[%s2929_s2 + $0x20] sm:$0xff] }
  0xa0   :  { %v2108_v45 = vpop.permute.xlu1 %524  ;;  %1789 = vset.pattern.permute.xlu1 %v2941_v3 }
  0xa1   :  { %743 = vperm.xlu1 %1789, %v701_v43   ;;  %v2117_v50 = vpop.permute.xlu0 %260  ;;  %v402_v43 = vmul.f32 %v2138_v13, %v2085_v35  ;;  %v624_v4 = vmul.f32 %v2156_v21, %v2108_v45  ;;  %v626_v6 = vmul.f32 %v2160_v23, %v2108_v45  ;;  %v623_v7 = vmul.f32 %v2149_v18, %v2108_v45 }
  0xa2   :  { %v625_v38 = vmul.f32 %v2158_v22, %v2108_v45 }
  0xa5   :  { %v2124_v59 = vpop.permute.xlu1 %288  ;;  %1790 = vset.pattern.permute.xlu1 %v2937_v5  ;;  %v2127_v60 = vpop.permute.xlu0 %252 }
  0xa6   :  { %248 = vperm.xlu1 %1790, %v2037_v24  }
  0xa9   :  { %v2140_v14 = vpop.permute.xlu0 %244 }
  0xaa   :  { %2950 = vst [vmem:[#allocation6_spill] sm:$0xff] %v2140_v14  ;;  %v2142_v15 = vpop.permute.xlu1 %788  ;;  %1791 = vset.pattern.permute.xlu1 %v2936_v2 }
  0xab   :  { %480 = vperm.xlu1 %1791, %v1981_v11   ;;  %v398_v11 = vmul.f32 %v2138_v13, %v2082_v34 }
  0xad   :  { %v462_v56 = vadd.f32 %v398_v11, %v234_v48  ;;  %v392_v11 = vmul.f32 %v2136_v10, %v2096_v40 }
  0xae   :  { %v2178_v44 = vpop.permute.xlu1 %114  ;;  %v135_v46 = vpop.permute.xlu0 %134 }
  0xaf   :  { %1792 = vset.pattern.permute.xlu1 %v2941_v3  ;;  %v235_v35 = vmul.f32 %v2130_v1, %v135_v46  ;;  %v236_v52 = vmul.f32 %v2132_v8, %v135_v46  ;;  %v237_v53 = vmul.f32 %v2145_v16, %v135_v46  ;;  %v238_v54 = vmul.f32 %v2147_v17, %v135_v46 }
  0xb0   :  { %64 = vperm.xlu1 %1792, %v1988_v12   ;;  %v461_v46 = vadd.f32 %v397_v51, %v233_v47 }
  0xb1   :  { %v464_v58 = vadd.f32 %v400_v30, %v236_v52  ;;  %v466_v61 = vadd.f32 %v402_v43, %v238_v54  ;;  %v463_v62 = vadd.f32 %v399_v29, %v235_v35  ;;  %v465_v63 = vadd.f32 %v401_v31, %v237_v53 }
  0xb2   :  { %v125_v34 = vpop.permute.xlu0 %124  ;;  %v394_v29 = vmul.f32 %v2138_v13, %v2096_v40  ;;  %v688_v52 = vadd.f32 %v624_v4, %v460_v55  ;;  %v690_v53 = vadd.f32 %v626_v6, %v462_v56  ;;  %v687_v54 = vadd.f32 %v623_v7, %v459_v57 }
  0xb3   :  { %v2200_v0 = vpop.permute.xlu1 %516  ;;  %v228_v30 = vmul.f32 %v2132_v8, %v125_v34  ;;  %v230_v31 = vmul.f32 %v2147_v17, %v125_v34  ;;  %v692_v47 = vadd.f32 %v628_v20, %v464_v58  ;;  %v694_v48 = vadd.f32 %v630_v25, %v466_v61 }
  0xb4   :  { %1794 = vset.pattern.permute.xlu1 %v2936_v2  ;;  %v691_v51 = vadd.f32 %v627_v27, %v463_v62  ;;  %v693_v35 = vadd.f32 %v629_v28, %v465_v63  ;;  %v227_v62 = vmul.f32 %v2130_v1, %v125_v34  ;;  %v229_v63 = vmul.f32 %v2145_v16, %v125_v34 }
  0xb5   :  { %476 = vperm.xlu1 %1794, %v2037_v24   ;;  %v852_v5 = vadd.f32 %v2142_v15, %v692_v47  ;;  %v854_v24 = vadd.f32 %v2142_v15, %v694_v48  ;;  %v456_v20 = vadd.f32 %v392_v11, %v228_v30  ;;  %v458_v55 = vadd.f32 %v394_v29, %v230_v31 }
  0xb6   :  { %v2224_v43 = vpop.permute.xlu0 %119  ;;  %v851_v58 = vadd.f32 %v2142_v15, %v691_v51  ;;  %v853_v61 = vadd.f32 %v2142_v15, %v693_v35  ;;  %v391_v7 = vmul.f32 %v2134_v9, %v2096_v40  ;;  %v393_v15 = vmul.f32 %v2151_v19, %v2096_v40 }
  0xb7   :  { %v916_v56 = vmax.f32 %v852_v5, 0.0  ;;  %v918_v57 = vmax.f32 %v854_v24, 0.0  ;;  %v689_v25 = vadd.f32 %v625_v38, %v461_v46  ;;  %v619_v5 = vmul.f32 %v2149_v18, %v2080_v33 }
  0xb8   :  { %v784_v2 = vpop.permute.xlu1 %783  ;;  %v915_v4 = vmax.f32 %v851_v58, 0.0  ;;  %v917_v6 = vmax.f32 %v853_v61, 0.0  ;;  %v621_v11 = vmul.f32 %v2158_v22, %v2080_v33  ;;  %v455_v31 = vadd.f32 %v391_v7, %v227_v62 }
  0xb9   :  { %1795 = vset.pattern.permute.xlu1 %v2941_v3  ;;  %1031 = vmatprep.subr.mxu0 %v916_v56  ;;  %v848_v34 = vadd.f32 %v784_v2, %v688_v52  ;;  %v850_v27 = vadd.f32 %v784_v2, %v690_v53  ;;  %v847_v28 = vadd.f32 %v784_v2, %v687_v54  ;;  %v2951_v38 = vmov 1  }
  0xba   :  { %v2238_v45 = vpop.permute.xlu0 %109  ;;  %733 = vperm.xlu1 %1795, %v699_v37   ;;  %1192 = vmatprep.subr.mxu1 %v918_v57  ;;  %v849_v30 = vadd.f32 %v784_v2, %v689_v25  ;;  %v457_v47 = vadd.f32 %v393_v15, %v229_v63  ;;  %v684_v46 = vadd.f32 %v2186_v49, %v456_v20  ;;  %v2952_v54 = vmov 2  }
  0xbb   :  { %1032 = vmatpush1.msra.mxu0 %v915_v4  ;;  %1193 = vmatpush1.msra.mxu1 %v917_v6  ;;  %v686_v48 = vadd.f32 %v2198_v32, %v458_v55  ;;  %v912_v51 = vmax.f32 %v848_v34, 0.0  ;;  %v914_v35 = vmax.f32 %v850_v27, 0.0  ;;  %v911_v37 = vmax.f32 %v847_v28, 0.0 }
  0xbc   :  { %v913_v52 = vmax.f32 %v849_v30, 0.0  ;;  %v683_v24 = vadd.f32 %v619_v5, %v455_v31  ;;  %v685_v58 = vadd.f32 %v621_v11, %v457_v47  ;;  %v383_v63 = vmul.f32 %v2134_v9, %v2088_v36  ;;  %v696_v47 = vld [vmem:[%s2929_s2 + $0x8] sm:$0xff] }
  0xbd   :  { %v2248_v29 = vpop.permute.xlu1 %280  ;;  %1033 = vmatprep.subr.mxu0 %v912_v51  ;;  %1194 = vmatprep.subr.mxu1 %v914_v35  ;;  %v384_v20 = vmul.f32 %v2136_v10, %v2088_v36  ;;  %v385_v55 = vmul.f32 %v2151_v19, %v2088_v36  ;;  %v386_v56 = vmul.f32 %v2138_v13, %v2088_v36 }
  0xbe   :  { %v779_v40 = vpop.permute.xlu0 %778  ;;  %1796 = vset.pattern.permute.xlu1 %v2951_v38  ;;  %1034 = vmatpush1.msra.mxu0 %v911_v37  ;;  %v220_v57 = vmul.f32 %v2132_v8, %v2178_v44  ;;  %v219_v15 = vmul.f32 %v2130_v1, %v2178_v44  ;;  %v223_v25 = vmul.f32 %v2130_v1, %v2224_v43 }
  0xbf   :  { %240 = vperm.xlu1 %1796, %v2048_v26   ;;  %v844_v33 = vadd.f32 %v779_v40, %v684_v46  ;;  %v846_v53 = vadd.f32 %v779_v40, %v686_v48  ;;  %1195 = vmatpush1.msra.mxu1 %v913_v52  ;;  %v843_v61 = vadd.f32 %v779_v40, %v683_v24 }
  0xc0   :  { %v845_v62 = vadd.f32 %v779_v40, %v685_v58  ;;  %v225_v36 = vmul.f32 %v2145_v16, %v2224_v43  ;;  %v226_v34 = vmul.f32 %v2147_v17, %v2224_v43  ;;  %v388_v28 = vmul.f32 %v2136_v10, %v2124_v59 }
  0xc1   :  { %v908_v49 = vmax.f32 %v844_v33, 0.0  ;;  %v910_v32 = vmax.f32 %v846_v53, 0.0  ;;  %v907_v4 = vmax.f32 %v843_v61, 0.0  ;;  %v222_v5 = vmul.f32 %v2147_v17, %v2178_v44 }
  0xc2   :  { %v513_v2 = vpop.permute.xlu1 %512  ;;  %v909_v6 = vmax.f32 %v845_v62, 0.0  ;;  %v2278_v27 = vpop.permute.xlu0 %99  ;;  %v387_v30 = vmul.f32 %v2134_v9, %v2124_v59  ;;  %v390_v31 = vmul.f32 %v2138_v13, %v2124_v59  ;;  %v448_v40 = vadd.f32 %v384_v20, %v220_v57  ;;  %v943_v62 = vld [vmem:[%s2931_s4 + $0x40] sm:$0xff] }
  0xc3   :  { %1797 = vset.pattern.permute.xlu1 %v2952_v54  ;;  %1035 = vmatprep.subr.mxu0 %v908_v49  ;;  %v612_v11 = vmul.f32 %v2156_v21, %v513_v2  ;;  %v611_v48 = vmul.f32 %v2149_v18, %v513_v2  ;;  %v614_v51 = vmul.f32 %v2160_v23, %v513_v2 }
  0xc4   :  { %472 = vperm.xlu1 %1797, %v1988_v12   ;;  %v224_v12 = vmul.f32 %v2132_v8, %v2224_v43  ;;  %1196 = vmatprep.subr.mxu1 %v910_v32  ;;  %v389_v43 = vmul.f32 %v2151_v19, %v2124_v59  ;;  %v447_v35 = vadd.f32 %v383_v63, %v219_v15 }
  0xc5   :  { %1036 = vmatpush1.msra.mxu0 %v907_v4  ;;  %1197 = vmatpush1.msra.mxu1 %v909_v6  ;;  %v451_v37 = vadd.f32 %v387_v30, %v223_v25  ;;  %v454_v33 = vadd.f32 %v390_v31, %v226_v34  ;;  %v450_v59 = vadd.f32 %v386_v56, %v222_v5 }
  0xc6   :  { %v452_v46 = vadd.f32 %v388_v28, %v224_v12  ;;  %v453_v52 = vadd.f32 %v389_v43, %v225_v36  ;;  %v613_v54 = vmul.f32 %v2158_v22, %v513_v2  ;;  %v676_v24 = vadd.f32 %v612_v11, %v448_v40  ;;  %v769_v61 = vpop.permute.xlu0 %768 }
  0xc7   :  { %v2268_v7 = vpop.permute.xlu1 %104  ;;  %v615_v58 = vmul.f32 %v2149_v18, %v2200_v0  ;;  %v617_v49 = vmul.f32 %v2158_v22, %v2200_v0  ;;  %v618_v32 = vmul.f32 %v2160_v23, %v2200_v0  ;;  %v678_v56 = vadd.f32 %v614_v51, %v450_v59  ;;  %v949_v59 = vld [vmem:[%s2931_s4 + $0x70] sm:$0xff] }
  0xc8   :  { %468 = vperm.xlu1 %1797, %v2048_v26   ;;  %v221_v26 = vmul.f32 %v2145_v16, %v2178_v44  ;;  %v616_v44 = vmul.f32 %v2156_v21, %v2200_v0  ;;  %v675_v2 = vadd.f32 %v611_v48, %v447_v35  ;;  %v836_v15 = vadd.f32 %v769_v61, %v676_v24  ;;  %v945_v0 = vld [vmem:[%s2931_s4 + $0x50] sm:$0xff]  ;;  %v947_v35 = vld [vmem:[%s2931_s4 + $0x60] sm:$0xff] }
  0xc9   :  { %v682_v57 = vadd.f32 %v618_v32, %v454_v33  ;;  %v679_v12 = vadd.f32 %v615_v58, %v451_v37  ;;  %v681_v4 = vadd.f32 %v617_v49, %v453_v52  ;;  %v2939_v36 = vmov 0.0  }
  0xca   :  { %v449_v63 = vadd.f32 %v385_v55, %v221_v26  ;;  %v680_v20 = vadd.f32 %v616_v44, %v452_v46  ;;  %1095 = vmatprep.mubr.f32.mxu0 %v2939_v36  ;;  %1256 = vmatprep.mubr.f32.mxu1 %v2939_v36  ;;  %v838_v11 = vadd.f32 %v769_v61, %v678_v56  ;;  %v900_v48 = vmax.f32 %v836_v15, 0.0  ;;  %v2347_v56 = vpop.permute.xlu0 %89 }
  0xcb   :  { %v835_v30 = vadd.f32 %v769_v61, %v675_v2  ;;  %v375_v44 = vmul.f32 %v2134_v9, %v2094_v39  ;;  %v377_v24 = vmul.f32 %v2151_v19, %v2094_v39  ;;  %v378_v58 = vmul.f32 %v2138_v13, %v2094_v39 }
  0xcc   :  { %v2299_v53 = vpop.permute.xlu1 %508  ;;  %1798 = vset.pattern.permute.xlu1 %v2941_v3  ;;  %v677_v25 = vadd.f32 %v613_v54, %v449_v63  ;;  %v902_v51 = vmax.f32 %v838_v11, 0.0  ;;  %v376_v54 = vmul.f32 %v2136_v10, %v2094_v39  ;;  %v212_v49 = vmul.f32 %v2132_v8, %v2268_v7 }
  0xcd   :  { %718 = vperm.xlu1 %1798, %v696_v47   ;;  %v899_v37 = vmax.f32 %v835_v30, 0.0  ;;  %v217_v63 = vmul.f32 %v2145_v16, %v2238_v45  ;;  %v211_v39 = vmul.f32 %v2130_v1, %v2268_v7  ;;  %v213_v2 = vmul.f32 %v2145_v16, %v2268_v7 }
  0xce   :  { %v837_v40 = vadd.f32 %v769_v61, %v677_v25  ;;  %v215_v61 = vmul.f32 %v2130_v1, %v2238_v45  ;;  %v382_v15 = vmul.f32 %v2138_v13, %v2248_v29  ;;  %v440_v25 = vadd.f32 %v376_v54, %v212_v49 }
  0xcf   :  { %v610_v11 = vmul.f32 %v2160_v23, %v2299_v53  ;;  %v439_v30 = vadd.f32 %v375_v44, %v211_v39 }
  0xd0   :  { %v901_v52 = vmax.f32 %v837_v40, 0.0 }
  0xd1   :  { %v774_v6 = vpop.permute.xlu1 %773  ;;  %993 = vperm.xlu1 %1798, %v943_v62   ;;  %v216_v62 = vmul.f32 %v2132_v8, %v2238_v45 }
  0xd2   :  { %v840_v34 = vadd.f32 %v774_v6, %v680_v20  ;;  %v842_v28 = vadd.f32 %v774_v6, %v682_v57  ;;  %v839_v55 = vadd.f32 %v774_v6, %v679_v12  ;;  %v841_v5 = vadd.f32 %v774_v6, %v681_v4 }
  0xd3   :  { %v218_v20 = vmul.f32 %v2147_v17, %v2238_v45  ;;  %v214_v57 = vmul.f32 %v2147_v17, %v2268_v7  ;;  %v379_v4 = vmul.f32 %v2134_v9, %v2248_v29  ;;  %v380_v45 = vmul.f32 %v2136_v10, %v2248_v29 }
  0xd4   :  { %v904_v43 = vmax.f32 %v840_v34, 0.0  ;;  %v906_v31 = vmax.f32 %v842_v28, 0.0  ;;  %v903_v26 = vmax.f32 %v839_v55, 0.0  ;;  %v905_v47 = vmax.f32 %v841_v5, 0.0 }
  0xd5   :  { %1003 = vperm.xlu1 %1798, %v945_v0   ;;  %v381_v6 = vmul.f32 %v2151_v19, %v2248_v29  ;;  %v607_v28 = vmul.f32 %v2149_v18, %v2299_v53  ;;  %v608_v55 = vmul.f32 %v2156_v21, %v2299_v53  ;;  %v609_v5 = vmul.f32 %v2158_v22, %v2299_v53 }
  0xd6   :  { %v2319_v46 = vpop.permute.xlu1 %272  ;;  %1037 = vmatprep.subr.mxu0 %v904_v43  ;;  %1198 = vmatprep.subr.mxu1 %v906_v31  ;;  %v441_v43 = vadd.f32 %v377_v24, %v213_v2  ;;  %v442_v31 = vadd.f32 %v378_v58, %v214_v57  ;;  %v444_v40 = vadd.f32 %v380_v45, %v216_v62 }
  0xd7   :  { %1038 = vmatpush1.msra.mxu0 %v903_v26  ;;  %1199 = vmatpush1.msra.mxu1 %v905_v47  ;;  %v443_v47 = vadd.f32 %v379_v4, %v215_v61 }
  0xd8   :  { %1039 = vmatprep.subr.mxu0 %v900_v48  ;;  %1200 = vmatprep.subr.mxu1 %v902_v51  ;;  %v445_v48 = vadd.f32 %v381_v6, %v217_v63  ;;  %v446_v51 = vadd.f32 %v382_v15, %v218_v20  ;;  %v367_v15 = vmul.f32 %v2134_v9, %v2102_v42 }
  0xd9   :  { %1013 = vperm.xlu1 %1798, %v947_v35   ;;  %1040 = vmatpush1.msra.mxu0 %v899_v37  ;;  %v759_v35 = vpop.permute.xlu0 %758  ;;  %v671_v49 = vadd.f32 %v607_v28, %v443_v47  ;;  %v2403_v28 = vld [vmem:[%s2932_s5] sm:$0xff]  ;;  %v371_v47 = vmul.f32 %v2134_v9, %v2319_v46 }
  0xda   :  { %1201 = vmatpush1.msra.mxu1 %v901_v52  ;;  %v674_v54 = vadd.f32 %v610_v11, %v446_v51  ;;  %v673_v36 = vadd.f32 %v609_v5, %v445_v48  ;;  %v209_v5 = vmul.f32 %v2145_v16, %v2278_v27  ;;  %v210_v11 = vmul.f32 %v2147_v17, %v2278_v27 }
  0xdb   :  { %v505_v33 = vpop.permute.xlu1 %504  ;;  %v374_v48 = vmul.f32 %v2138_v13, %v2319_v46 }
  0xdc   :  { %v604_v12 = vmul.f32 %v2156_v21, %v505_v33  ;;  %v603_v0 = vmul.f32 %v2149_v18, %v505_v33  ;;  %v605_v7 = vmul.f32 %v2158_v22, %v505_v33  ;;  %v606_v34 = vmul.f32 %v2160_v23, %v505_v33 }
  0xdd   :  { %1023 = vperm.xlu1 %1798, %v949_v59   ;;  %v672_v59 = vadd.f32 %v608_v55, %v444_v40  ;;  %v208_v55 = vmul.f32 %v2132_v8, %v2278_v27  ;;  %v373_v40 = vmul.f32 %v2151_v19, %v2319_v46 }
  0xde   :  { %v668_v26 = vadd.f32 %v604_v12, %v440_v25  ;;  %v670_v37 = vadd.f32 %v606_v34, %v442_v31  ;;  %v667_v52 = vadd.f32 %v603_v0, %v439_v30  ;;  %v669_v33 = vadd.f32 %v605_v7, %v441_v43  ;;  %v2417_v30 = vld [vmem:[%s2932_s5 + $0x20] sm:$0xff] }
  0xdf   :  { %v369_v25 = vmul.f32 %v2151_v19, %v2102_v42  ;;  %v370_v0 = vmul.f32 %v2138_v13, %v2102_v42  ;;  %v207_v7 = vmul.f32 %v2130_v1, %v2278_v27 }
  0xe0   :  { %v2337_v32 = vpop.permute.xlu1 %94  ;;  %v828_v53 = vadd.f32 %v759_v35, %v668_v26  ;;  %v830_v58 = vadd.f32 %v759_v35, %v670_v37  ;;  %v827_v39 = vadd.f32 %v759_v35, %v667_v52  ;;  %v829_v61 = vadd.f32 %v759_v35, %v669_v33  ;;  %v2433_v35 = vpop.permute.xlu0 %79 }
  0xe1   :  { %1799 = vset.pattern.permute.xlu1 %v2951_v38  ;;  %v203_v43 = vmul.f32 %v2130_v1, %v2337_v32  ;;  %v205_v31 = vmul.f32 %v2145_v16, %v2337_v32  ;;  %v206_v26 = vmul.f32 %v2147_v17, %v2337_v32 }
  0xe2   :  { %v892_v12 = vmax.f32 %v828_v53, 0.0  ;;  %v894_v4 = vmax.f32 %v830_v58, 0.0  ;;  %v891_v45 = vmax.f32 %v827_v39, 0.0  ;;  %v893_v6 = vmax.f32 %v829_v61, 0.0  ;;  %1590 = vperm.xlu1 %1799, %v2403_v28  }
  0xe3   :  { %v433_v58 = vadd.f32 %v369_v25, %v205_v31  ;;  %v434_v39 = vadd.f32 %v370_v0, %v206_v26 }
  0xe5   :  { %v2376_v29 = vpop.permute.xlu1 %500 }
  0xe6   :  { %v600_v37 = vmul.f32 %v2156_v21, %v2376_v29  ;;  %v602_v53 = vmul.f32 %v2160_v23, %v2376_v29 }
  0xea   :  { %v764_v3 = vpop.permute.xlu1 %763 }
  0xeb   :  { %v832_v41 = vadd.f32 %v764_v3, %v672_v59  ;;  %v834_v14 = vadd.f32 %v764_v3, %v674_v54  ;;  %v831_v44 = vadd.f32 %v764_v3, %v671_v49  ;;  %v833_v24 = vadd.f32 %v764_v3, %v673_v36  ;;  %v2443_v59 = vld [vmem:[%s2932_s5 + $0x10] sm:$0xff] }
  0xec   :  { %v204_v36 = vmul.f32 %v2132_v8, %v2337_v32  ;;  %v601_v49 = vmul.f32 %v2158_v22, %v2376_v29  ;;  %1598 = vperm.xlu1 %1799, %v2443_v59  }
  0xed   :  { %v896_v62 = vmax.f32 %v832_v41, 0.0  ;;  %v898_v63 = vmax.f32 %v834_v14, 0.0  ;;  %v895_v20 = vmax.f32 %v831_v44, 0.0  ;;  %v897_v2 = vmax.f32 %v833_v24, 0.0  ;;  %v2383_v41 = vld [vmem:[%s2932_s5 + $0x8] sm:$0xff] }
  0xee   :  { %1594 = vperm.xlu0 %1800, %v2383_v41   ;;  %v368_v14 = vmul.f32 %v2136_v10, %v2102_v42  ;;  %v372_v42 = vmul.f32 %v2136_v10, %v2319_v46  ;;  %v599_v46 = vmul.f32 %v2149_v18, %v2376_v29  ;;  %v431_v24 = vadd.f32 %v367_v15, %v203_v43  ;;  %v944_v29 = vld [vmem:[%s2931_s4 + $0x48] sm:$0xff] }
  0xef   :  { %v2378_v57 = vpop.permute.xlu1 %264  ;;  %1041 = vmatprep.subr.mxu0 %v896_v62  ;;  %1202 = vmatprep.subr.mxu1 %v898_v63  ;;  %v2953_v62 = vmov 0   ;;  %v435_v63 = vadd.f32 %v371_v47, %v207_v7  ;;  %v2470_v47 = vld [vmem:[%s2932_s5 + $0x28] sm:$0xff] }
  0xf0   :  { %1042 = vmatpush1.msra.mxu0 %v895_v20  ;;  %1203 = vmatpush1.msra.mxu1 %v897_v2  ;;  %v432_v51 = vadd.f32 %v368_v14, %v204_v36  ;;  %v436_v54 = vadd.f32 %v372_v42, %v208_v55  ;;  %v437_v20 = vadd.f32 %v373_v40, %v209_v5  ;;  %v749_v14 = vpop.permute.xlu0 %748 }
  0xf1   :  { %1043 = vmatprep.subr.mxu0 %v892_v12  ;;  %1204 = vmatprep.subr.mxu1 %v894_v4  ;;  %v438_v2 = vadd.f32 %v374_v48, %v210_v11  ;;  %v663_v15 = vadd.f32 %v599_v46, %v435_v63  ;;  %2954 = vst [vmem:[#allocation7_spill] sm:$0xff] %v2470_v47 }
  0xf2   :  { %1044 = vmatpush1.msra.mxu0 %v891_v45  ;;  %1205 = vmatpush1.msra.mxu1 %v893_v6  ;;  %v664_v12 = vadd.f32 %v600_v37, %v436_v54  ;;  %v665_v25 = vadd.f32 %v601_v49, %v437_v20  ;;  %v948_v49 = vld [vmem:[%s2931_s4 + $0x68] sm:$0xff]  ;;  %v360_v63 = vmul.f32 %v2136_v10, %v2117_v50 }
  0xf3   :  { %1606 = vperm.xlu0 %1800, %v2417_v30   ;;  %v666_v36 = vadd.f32 %v602_v53, %v438_v2  ;;  %v936_v53 = vld [vmem:[%s2931_s4 + $0x8] sm:$0xff]  ;;  %v361_v20 = vmul.f32 %v2151_v19, %v2117_v50  ;;  %v362_v2 = vmul.f32 %v2138_v13, %v2117_v50 }
  0xf4   :  { %v497_v3 = vpop.permute.xlu1 %496 }
  0xf5   :  { %v596_v27 = vmul.f32 %v2156_v21, %v497_v3  ;;  %v595_v32 = vmul.f32 %v2149_v18, %v497_v3  ;;  %v597_v52 = vmul.f32 %v2158_v22, %v497_v3  ;;  %v598_v33 = vmul.f32 %v2160_v23, %v497_v3  ;;  %v2461_v3 = vld [vmem:[%s2932_s5 + $0x18] sm:$0xff] }
  0xf6   :  { %1602 = vperm.xlu1 %1799, %v2461_v3  }
  0xf7   :  { %v660_v61 = vadd.f32 %v596_v27, %v432_v51  ;;  %1801 = vset.pattern.permute.xlu0 %v2953_v62  ;;  %v662_v4 = vadd.f32 %v598_v33, %v434_v39  ;;  %v659_v45 = vadd.f32 %v595_v32, %v431_v24  ;;  %v661_v6 = vadd.f32 %v597_v52, %v433_v58  ;;  %v946_v27 = vld [vmem:[%s2931_s4 + $0x58] sm:$0xff]  ;;  %v2488_v39 = vld [vmem:[%s2932_s5 + $0x30] sm:$0xff] }
  0xf8   :  { %998 = vperm.xlu0 %1801, %v944_v29   ;;  %v950_v58 = vld [vmem:[%s2931_s4 + $0x78] sm:$0xff]  ;;  %2955 = vst [vmem:[#allocation8_spill] sm:$0xff] %v2488_v39  ;;  %v200_v29 = vmul.f32 %v2132_v8, %v2347_v56 }
  0xf9   :  { %v2398_v34 = vpop.permute.xlu1 %84  ;;  %v820_v7 = vadd.f32 %v749_v14, %v660_v61  ;;  %v822_v43 = vadd.f32 %v749_v14, %v662_v4  ;;  %v819_v31 = vadd.f32 %v749_v14, %v659_v45  ;;  %v821_v26 = vadd.f32 %v749_v14, %v661_v6  ;;  %v935_v45 = vld [vmem:[%s2931_s4] sm:$0xff] }
  0xfa   :  { %1610 = vperm.xlu1 %1799, %v2470_v47   ;;  %v359_v61 = vmul.f32 %v2134_v9, %v2117_v50  ;;  %v199_v6 = vmul.f32 %v2130_v1, %v2347_v56  ;;  %v201_v50 = vmul.f32 %v2145_v16, %v2347_v56  ;;  %v202_v14 = vmul.f32 %v2147_v17, %v2347_v56 }
  0xfb   :  { %v884_v52 = vmax.f32 %v820_v7, 0.0  ;;  %v886_v33 = vmax.f32 %v822_v43, 0.0  ;;  %v883_v54 = vmax.f32 %v819_v31, 0.0  ;;  %v885_v46 = vmax.f32 %v821_v26, 0.0  ;;  %v2525_v7 = vld [vmem:[%s2932_s5 + $0x38] sm:$0xff] }
  0xfc   :  { %1008 = vperm.xlu0 %1801, %v946_v27   ;;  %2956 = vst [vmem:[#allocation9_spill] sm:$0xff] %v2525_v7  ;;  %v363_v56 = vmul.f32 %v2134_v9, %v2378_v57  ;;  %v937_v27 = vld [vmem:[%s2931_s4 + $0x10] sm:$0xff] }
  0xfe   :  { %v2451_v44 = vpop.permute.xlu1 %492  ;;  %1802 = vset.pattern.permute.xlu1 %v2953_v62 }
  0xff   :  { %958 = vperm.xlu1 %1802, %v936_v53  }
 0x100   :  { %1018 = vperm.xlu0 %1801, %v948_v49   ;;  %v427_v49 = vadd.f32 %v363_v56, %v199_v6 }
 0x103   :  { %v754_v0 = vpop.permute.xlu1 %753  ;;  %1803 = vset.pattern.permute.xlu1 %v2951_v38 }
 0x104   :  { %v824_v55 = vadd.f32 %v754_v0, %v664_v12  ;;  %v826_v5 = vadd.f32 %v754_v0, %v666_v36  ;;  %v823_v11 = vadd.f32 %v754_v0, %v663_v15  ;;  %v825_v42 = vadd.f32 %v754_v0, %v665_v25  ;;  %1028 = vperm.xlu0 %1801, %v950_v58  }
 0x105   :  { %v196_v12 = vmul.f32 %v2132_v8, %v2398_v34  ;;  %1614 = vperm.xlu1 %1803, %v2488_v39   ;;  %v195_v36 = vmul.f32 %v2130_v1, %v2398_v34  ;;  %v197_v15 = vmul.f32 %v2145_v16, %v2398_v34  ;;  %v198_v25 = vmul.f32 %v2147_v17, %v2398_v34  ;;  %v2535_v34 = vpop.permute.xlu0 %69 }
 0x106   :  { %v888_v40 = vmax.f32 %v824_v55, 0.0  ;;  %v890_v48 = vmax.f32 %v826_v5, 0.0  ;;  %v887_v51 = vmax.f32 %v823_v11, 0.0  ;;  %v889_v37 = vmax.f32 %v825_v42, 0.0 }
 0x107   :  { %v364_v55 = vmul.f32 %v2136_v10, %v2378_v57  ;;  %v365_v5 = vmul.f32 %v2151_v19, %v2378_v57  ;;  %v366_v11 = vmul.f32 %v2138_v13, %v2378_v57  ;;  %v424_v42 = vadd.f32 %v360_v63, %v196_v12 }
 0x108   :  { %v2473_v32 = vpop.permute.xlu1 %256  ;;  %1045 = vmatprep.subr.mxu0 %v888_v40  ;;  %1206 = vmatprep.subr.mxu1 %v890_v48  ;;  %v591_v40 = vmul.f32 %v2149_v18, %v2451_v44  ;;  %v592_v57 = vmul.f32 %v2156_v21, %v2451_v44  ;;  %v593_v48 = vmul.f32 %v2158_v22, %v2451_v44 }
 0x109   :  { %1046 = vmatpush1.msra.mxu0 %v887_v51  ;;  %1207 = vmatpush1.msra.mxu1 %v889_v37  ;;  %v594_v51 = vmul.f32 %v2160_v23, %v2451_v44  ;;  %v428_v53 = vadd.f32 %v364_v55, %v200_v29  ;;  %v430_v58 = vadd.f32 %v366_v11, %v202_v14  ;;  %v938_v44 = vld [vmem:[%s2931_s4 + $0x18] sm:$0xff]  ;;  %v739_v38 = vpop.permute.xlu0 %738 }
 0x10a   :  { %1047 = vmatprep.subr.mxu0 %v884_v52  ;;  %1208 = vmatprep.subr.mxu1 %v886_v33  ;;  %v423_v52 = vadd.f32 %v359_v61, %v195_v36  ;;  %v425_v33 = vadd.f32 %v361_v20, %v197_v15  ;;  %v939_v36 = vld [vmem:[%s2931_s4 + $0x20] sm:$0xff] }
 0x10b   :  { %1048 = vmatpush1.msra.mxu0 %v883_v54  ;;  %1209 = vmatpush1.msra.mxu1 %v885_v46  ;;  %v426_v54 = vadd.f32 %v362_v2, %v198_v25  ;;  %v656_v47 = vadd.f32 %v592_v57, %v428_v53  ;;  %v658_v39 = vadd.f32 %v594_v51, %v430_v58  ;;  %v941_v57 = vld [vmem:[%s2931_s4 + $0x30] sm:$0xff] }
 0x10c   :  { %953 = vperm.xlu0 %1801, %v935_v45   ;;  %1618 = vperm.xlu1 %1803, %v2525_v7   ;;  %v655_v7 = vadd.f32 %v591_v40, %v427_v49  ;;  %v194_v40 = vmul.f32 %v2147_v17, %v2433_v35  ;;  %v357_v51 = vmul.f32 %v2151_v19, %v2473_v32 }
 0x10d   :  { %v489_v24 = vpop.permute.xlu1 %488  ;;  %v353_v49 = vmul.f32 %v2151_v19, %v2127_v60  ;;  %v354_v53 = vmul.f32 %v2138_v13, %v2127_v60  ;;  %v185_v58 = vmul.f32 %v2145_v16, %v2535_v34 }
 0x10e   :  { %v588_v0 = vmul.f32 %v2156_v21, %v489_v24  ;;  %v587_v43 = vmul.f32 %v2149_v18, %v489_v24  ;;  %v589_v31 = vmul.f32 %v2158_v22, %v489_v24  ;;  %v590_v26 = vmul.f32 %v2160_v23, %v489_v24 }
 0x10f   :  { %v429_v24 = vadd.f32 %v365_v5, %v201_v50 }
 0x110   :  { %v652_v46 = vadd.f32 %v588_v0, %v424_v42  ;;  %963 = vperm.xlu0 %1801, %v937_v27   ;;  %v654_v63 = vadd.f32 %v590_v26, %v426_v54  ;;  %v651_v12 = vadd.f32 %v587_v43, %v423_v52  ;;  %v653_v45 = vadd.f32 %v589_v31, %v425_v33 }
 0x111   :  { %v657_v61 = vadd.f32 %v593_v48, %v429_v24  ;;  %1804 = vset.pattern.permute.xlu1 %v2953_v62  ;;  %v351_v42 = vmul.f32 %v2134_v9, %v2127_v60  ;;  %v191_v31 = vmul.f32 %v2130_v1, %v2433_v35  ;;  %v192_v26 = vmul.f32 %v2132_v8, %v2433_v35 }
 0x112   :  { %v2500_v4 = vpop.permute.xlu1 %74  ;;  %v812_v2 = vadd.f32 %v739_v38, %v652_v46  ;;  %1395 = vperm.xlu1 %1804, %v2403_v28   ;;  %v814_v15 = vadd.f32 %v739_v38, %v654_v63  ;;  %v811_v25 = vadd.f32 %v739_v38, %v651_v12  ;;  %v813_v0 = vadd.f32 %v739_v38, %v653_v45  ;;  %v940_v38 = vld [vmem:[%s2931_s4 + $0x28] sm:$0xff] }
 0x113   :  { %v193_v27 = vmul.f32 %v2145_v16, %v2433_v35  ;;  %v356_v48 = vmul.f32 %v2136_v10, %v2473_v32  ;;  %v358_v52 = vmul.f32 %v2138_v13, %v2473_v32  ;;  %v352_v33 = vmul.f32 %v2136_v10, %v2127_v60  ;;  %v2614_v60 = vpop.permute.xlu0 %59 }
 0x114   :  { %968 = vperm.xlu0 %1801, %v938_v44   ;;  %v876_v28 = vmax.f32 %v812_v2, 0.0  ;;  %v187_v35 = vmul.f32 %v2130_v1, %v2500_v4  ;;  %v188_v54 = vmul.f32 %v2132_v8, %v2500_v4  ;;  %v189_v46 = vmul.f32 %v2145_v16, %v2500_v4  ;;  %v942_v2 = vld [vmem:[%s2931_s4 + $0x38] sm:$0xff] }
 0x115   :  { %v184_v24 = vmul.f32 %v2132_v8, %v2535_v34  ;;  %v186_v63 = vmul.f32 %v2147_v17, %v2535_v34  ;;  %v190_v12 = vmul.f32 %v2147_v17, %v2500_v4 }
 0x116   :  { %973 = vperm.xlu1 %1804, %v939_v36  }
 0x117   :  { %v2551_v37 = vpop.permute.xlu1 %484 }
 0x118   :  { %1400 = vperm.xlu0 %1801, %v2383_v41   ;;  %v355_v41 = vmul.f32 %v2134_v9, %v2473_v32  ;;  %v183_v32 = vmul.f32 %v2130_v1, %v2535_v34  ;;  %v584_v4 = vmul.f32 %v2156_v21, %v2551_v37 }
 0x11a   :  { %978 = vperm.xlu1 %1804, %v940_v38   ;;  %v419_v44 = vadd.f32 %v355_v41, %v191_v31 }
 0x11c   :  { %v744_v20 = vpop.permute.xlu1 %743  ;;  %1405 = vperm.xlu0 %1801, %v2443_v59   ;;  %v421_v59 = vadd.f32 %v357_v51, %v193_v27 }
 0x11d   :  { %v816_v6 = vadd.f32 %v744_v20, %v656_v47  ;;  %v818_v29 = vadd.f32 %v744_v20, %v658_v39  ;;  %v815_v50 = vadd.f32 %v744_v20, %v655_v7  ;;  %v817_v14 = vadd.f32 %v744_v20, %v657_v61 }
 0x11e   :  { %v878_v47 = vmax.f32 %v814_v15, 0.0  ;;  %v875_v39 = vmax.f32 %v811_v25, 0.0  ;;  %v877_v7 = vmax.f32 %v813_v0, 0.0  ;;  %983 = vperm.xlu1 %1804, %v941_v57   ;;  %v420_v61 = vadd.f32 %v356_v48, %v192_v26  ;;  %v2957_v48 = vld [vmem:[#allocation8_spill] sm:$0xff] }
 0x11f   :  { %v880_v56 = vmax.f32 %v816_v6, 0.0  ;;  %v882_v55 = vmax.f32 %v818_v29, 0.0  ;;  %v879_v5 = vmax.f32 %v815_v50, 0.0  ;;  %v881_v62 = vmax.f32 %v817_v14, 0.0 }
 0x120   :  { %v422_v20 = vadd.f32 %v358_v52, %v194_v40  ;;  %v415_v6 = vadd.f32 %v351_v42, %v187_v35  ;;  %v416_v29 = vadd.f32 %v352_v33, %v188_v54  ;;  %v417_v50 = vadd.f32 %v353_v49, %v189_v46  ;;  %1410 = vperm.xlu0 %1801, %v2461_v3  }
 0x121   :  { %v2562_v11 = vpop.permute.xlu1 %248  ;;  %1049 = vmatprep.subr.mxu0 %v880_v56  ;;  %1210 = vmatprep.subr.mxu1 %v882_v55  ;;  %v418_v25 = vadd.f32 %v354_v53, %v190_v12  ;;  %v648_v40 = vadd.f32 %v584_v4, %v420_v61  ;;  %v2958_v61 = vld [vmem:[#allocation7_spill] sm:$0xff] }
 0x122   :  { %1050 = vmatpush1.msra.mxu0 %v879_v5  ;;  %1211 = vmatpush1.msra.mxu1 %v881_v62  ;;  %v347_v14 = vmul.f32 %v2134_v9, %v2562_v11  ;;  %v348_v36 = vmul.f32 %v2136_v10, %v2562_v11  ;;  %v350_v15 = vmul.f32 %v2138_v13, %v2562_v11 }
 0x123   :  { %1051 = vmatprep.subr.mxu0 %v876_v28  ;;  %1212 = vmatprep.subr.mxu1 %v878_v47  ;;  %v583_v5 = vmul.f32 %v2149_v18, %v2551_v37  ;;  %v585_v62 = vmul.f32 %v2158_v22, %v2551_v37  ;;  %v586_v28 = vmul.f32 %v2160_v23, %v2551_v37 }
 0x124   :  { %1052 = vmatpush1.msra.mxu0 %v875_v39  ;;  %1213 = vmatpush1.msra.mxu1 %v877_v7  ;;  %v349_v3 = vmul.f32 %v2151_v19, %v2562_v11  ;;  %v411_v31 = vadd.f32 %v347_v14, %v183_v32  ;;  %v412_v26 = vadd.f32 %v348_v36, %v184_v24 }
 0x125   :  { %988 = vperm.xlu1 %1804, %v942_v2   ;;  %v414_v27 = vadd.f32 %v350_v15, %v186_v63  ;;  %1415 = vperm.xlu0 %1801, %v2417_v30   ;;  %v650_v52 = vadd.f32 %v586_v28, %v422_v20  ;;  %v647_v33 = vadd.f32 %v583_v5, %v419_v44 }
 0x126   :  { %v481_v43 = vpop.permute.xlu1 %480  ;;  %v413_v51 = vadd.f32 %v349_v3, %v185_v58  ;;  %v649_v35 = vadd.f32 %v585_v62, %v421_v59 }
 0x127   :  { %v580_v34 = vmul.f32 %v2156_v21, %v481_v43  ;;  %v579_v0 = vmul.f32 %v2149_v18, %v481_v43  ;;  %v581_v56 = vmul.f32 %v2158_v22, %v481_v43  ;;  %v582_v55 = vmul.f32 %v2160_v23, %v481_v43  ;;  %v729_v43 = vpop.permute.xlu0 %728 }
 0x129   :  { %v644_v42 = vadd.f32 %v580_v34, %v416_v29  ;;  %v646_v57 = vadd.f32 %v582_v55, %v418_v25  ;;  %v643_v41 = vadd.f32 %v579_v0, %v415_v6  ;;  %v645_v11 = vadd.f32 %v581_v56, %v417_v50  ;;  %1425 = vperm.xlu1 %1804, %v2957_v48   ;;  %v2959_v55 = vld [vmem:[#allocation6_spill] sm:$0xff] }
 0x12a   :  { %1420 = vperm.xlu0 %1801, %v2958_v61   ;;  %v343_v5 = vmul.f32 %v2134_v9, %v2959_v55  ;;  %v344_v3 = vmul.f32 %v2136_v10, %v2959_v55 }
 0x12b   :  { %v2612_v45 = vpop.permute.xlu1 %64  ;;  %v804_v46 = vadd.f32 %v729_v43, %v644_v42  ;;  %v806_v2 = vadd.f32 %v729_v43, %v646_v57  ;;  %v803_v6 = vadd.f32 %v729_v43, %v643_v41  ;;  %v805_v29 = vadd.f32 %v729_v43, %v645_v11  ;;  %v724_v34 = vpop.permute.xlu0 %723 }
 0x12c   :  { %v177_v57 = vmul.f32 %v2145_v16, %v2614_v60  ;;  %v178_v41 = vmul.f32 %v2147_v17, %v2614_v60  ;;  %v181_v11 = vmul.f32 %v2145_v16, %v2612_v45  ;;  %v182_v48 = vmul.f32 %v2147_v17, %v2612_v45 }
 0x12d   :  { %v868_v15 = vmax.f32 %v804_v46, 0.0  ;;  %v870_v0 = vmax.f32 %v806_v2, 0.0  ;;  %v867_v62 = vmax.f32 %v803_v6, 0.0  ;;  %v869_v28 = vmax.f32 %v805_v29, 0.0 }
 0x130   :  { %v477_v47 = vpop.permute.xlu1 %476 }
 0x131   :  { %v575_v39 = vmul.f32 %v2149_v18, %v477_v47  ;;  %v576_v7 = vmul.f32 %v2156_v21, %v477_v47  ;;  %v578_v38 = vmul.f32 %v2160_v23, %v477_v47  ;;  %v577_v37 = vmul.f32 %v2158_v22, %v477_v47 }
 0x133   :  { %v640_v49 = vadd.f32 %v576_v7, %v412_v26  ;;  %v642_v53 = vadd.f32 %v578_v38, %v414_v27  ;;  %v639_v32 = vadd.f32 %v575_v39, %v411_v31  ;;  %v641_v50 = vadd.f32 %v577_v37, %v413_v51  ;;  %v2960_v51 = vld [vmem:[#allocation9_spill] sm:$0xff] }
 0x134   :  { %v345_v26 = vmul.f32 %v2151_v19, %v2959_v55  ;;  %v346_v27 = vmul.f32 %v2138_v13, %v2959_v55  ;;  %v176_v37 = vmul.f32 %v2132_v8, %v2614_v60  ;;  %1430 = vperm.xlu0 %1801, %v2960_v51  }
 0x135   :  { %v734_v54 = vpop.permute.xlu1 %733  ;;  %v800_v4 = vadd.f32 %v724_v34, %v640_v49  ;;  %v802_v14 = vadd.f32 %v724_v34, %v642_v53  ;;  %v799_v25 = vadd.f32 %v724_v34, %v639_v32  ;;  %v801_v56 = vadd.f32 %v724_v34, %v641_v50  ;;  %v714_v50 = vpop.permute.xlu0 %713 }
 0x136   :  { %v808_v24 = vadd.f32 %v734_v54, %v648_v40  ;;  %v810_v63 = vadd.f32 %v734_v54, %v650_v52  ;;  %v807_v12 = vadd.f32 %v734_v54, %v647_v33  ;;  %v809_v30 = vadd.f32 %v734_v54, %v649_v35 }
 0x137   :  { %v864_v39 = vmax.f32 %v800_v4, 0.0  ;;  %v866_v7 = vmax.f32 %v802_v14, 0.0  ;;  %v863_v31 = vmax.f32 %v799_v25, 0.0 }
 0x138   :  { %v872_v58 = vmax.f32 %v808_v24, 0.0  ;;  %v874_v20 = vmax.f32 %v810_v63, 0.0  ;;  %v871_v44 = vmax.f32 %v807_v12, 0.0  ;;  %v873_v59 = vmax.f32 %v809_v30, 0.0 }
 0x139   :  { %v409_v63 = vadd.f32 %v345_v26, %v181_v11  ;;  %v410_v12 = vadd.f32 %v346_v27, %v182_v48  ;;  %v2961_v30 = vmov 1   ;;  %v925_v26 = vld [vmem:[%s2930_s3 + $0x30] sm:$0xff]  ;;  %v926_v27 = vld [vmem:[%s2930_s3 + $0x38] sm:$0xff] }
 0x13a   :  { %v241_v36 = vpop.permute.xlu1 %240  ;;  %1053 = vmatprep.subr.mxu0 %v872_v58  ;;  %1214 = vmatprep.subr.mxu1 %v874_v20 }
 0x13b   :  { %1054 = vmatpush1.msra.mxu0 %v871_v44  ;;  %1215 = vmatpush1.msra.mxu1 %v873_v59  ;;  %v339_v47 = vmul.f32 %v2134_v9, %v241_v36  ;;  %v340_v38 = vmul.f32 %v2136_v10, %v241_v36  ;;  %v341_v42 = vmul.f32 %v2151_v19, %v241_v36  ;;  %v865_v10 = vmax.f32 %v801_v56, 0.0 }
 0x13c   :  { %1055 = vmatprep.subr.mxu0 %v868_v15  ;;  %1216 = vmatprep.subr.mxu1 %v870_v0  ;;  %v342_v43 = vmul.f32 %v2138_v13, %v241_v36  ;;  %v175_v9 = vmul.f32 %v2130_v1, %v2614_v60  ;;  %v179_v19 = vmul.f32 %v2130_v1, %v2612_v45 }
 0x13d   :  { %1056 = vmatpush1.msra.mxu0 %v867_v62  ;;  %1217 = vmatpush1.msra.mxu1 %v869_v28  ;;  %v180_v13 = vmul.f32 %v2132_v8, %v2612_v45  ;;  %v404_v33 = vadd.f32 %v340_v38, %v176_v37  ;;  %v405_v35 = vadd.f32 %v341_v42, %v177_v57  ;;  %v921_v38 = vld [vmem:[%s2930_s3 + $0x10] sm:$0xff]  ;;  %v922_v42 = vld [vmem:[%s2930_s3 + $0x18] sm:$0xff]  ;;  %v931_v57 = vld [vmem:[%s2930_s3 + $0x60] sm:$0xff] }
 0x13e   :  { %1057 = vmatprep.subr.mxu0 %v864_v39  ;;  %1218 = vmatprep.subr.mxu1 %v866_v7  ;;  %v403_v52 = vadd.f32 %v339_v47, %v175_v9  ;;  %v406_v60 = vadd.f32 %v342_v43, %v178_v41  ;;  %v407_v32 = vadd.f32 %v343_v5, %v179_v19  ;;  %v919_v47 = vld [vmem:[%s2930_s3] sm:$0xff]  ;;  %v2962_v39 = vmov 0.0   ;;  %v920_v7 = vld [vmem:[%s2930_s3 + $0x8] sm:$0xff]  ;;  %v930_v37 = vld [vmem:[%s2930_s3 + $0x58] sm:$0xff] }
 0x13f   :  { %v473_v40 = vpop.permute.xlu1 %472  ;;  %1058 = vmatpush1.msra.mxu0 %v863_v31  ;;  %1219 = vmatpush1.msra.mxu1 %v865_v10  ;;  %v408_v24 = vadd.f32 %v344_v3, %v180_v13  ;;  %v923_v43 = vld [vmem:[%s2930_s3 + $0x20] sm:$0xff]  ;;  %v924_v31 = vld [vmem:[%s2930_s3 + $0x28] sm:$0xff]  ;;  %v929_v10 = vld [vmem:[%s2930_s3 + $0x50] sm:$0xff] }
 0x140   :  { %v571_v54 = vmul.f32 %v2149_v18, %v473_v40  ;;  %v572_v1 = vmul.f32 %v2156_v21, %v473_v40  ;;  %v573_v46 = vmul.f32 %v2158_v22, %v473_v40  ;;  %v574_v8 = vmul.f32 %v2160_v23, %v473_v40  ;;  %1805 = vset.pattern.permute.xlu0 %v2961_v30  ;;  %v927_v9 = vld [vmem:[%s2930_s3 + $0x40] sm:$0xff]  ;;  %v928_v40 = vld [vmem:[%s2930_s3 + $0x48] sm:$0xff]  ;;  %v933_v19 = vld [vmem:[%s2930_s3 + $0x70] sm:$0xff] }
 0x141   :  { %v932_v41 = vld [vmem:[%s2930_s3 + $0x68] sm:$0xff]  ;;  %v934_v13 = vld [vmem:[%s2930_s3 + $0x78] sm:$0xff]  ;;  %s2828_s3 = sld [smem:[#allocation2]] }
 0x142   :  { %v636_v34 = vadd.f32 %v572_v1, %v408_v24  ;;  %v638_v58 = vadd.f32 %v574_v8, %v410_v12  ;;  %v637_v20 = vadd.f32 %v573_v46, %v409_v63 }
 0x143   :  { %v469_v49 = vpop.permute.xlu1 %468 }
 0x144   :  { %v567_v16 = vmul.f32 %v2149_v18, %v469_v49  ;;  %v568_v17 = vmul.f32 %v2156_v21, %v469_v49  ;;  %v569_v45 = vmul.f32 %v2158_v22, %v469_v49  ;;  %v570_v53 = vmul.f32 %v2160_v23, %v469_v49 }
 0x145   :  { %v635_v18 = vadd.f32 %v571_v54, %v407_v32 }
 0x146   :  { %v632_v61 = vadd.f32 %v568_v17, %v404_v33  ;;  %v634_v2 = vadd.f32 %v570_v53, %v406_v60  ;;  %v631_v6 = vadd.f32 %v567_v16, %v403_v52  ;;  %v633_v29 = vadd.f32 %v569_v45, %v405_v35 }
 0x148   :  { %v719_v21 = vpop.permute.xlu1 %718  ;;  %v792_v44 = vadd.f32 %v714_v50, %v632_v61  ;;  %v794_v22 = vadd.f32 %v714_v50, %v634_v2  ;;  %v791_v36 = vadd.f32 %v714_v50, %v631_v6  ;;  %v793_v15 = vadd.f32 %v714_v50, %v633_v29 }
 0x149   :  { %v796_v59 = vadd.f32 %v719_v21, %v636_v34  ;;  %v798_v23 = vadd.f32 %v719_v21, %v638_v58  ;;  %v795_v4 = vadd.f32 %v719_v21, %v635_v18  ;;  %v797_v14 = vadd.f32 %v719_v21, %v637_v20 }
 0x14a   :  { %v856_v5 = vmax.f32 %v792_v44, 0.0  ;;  %v858_v62 = vmax.f32 %v794_v22, 0.0  ;;  %v855_v28 = vmax.f32 %v791_v36, 0.0  ;;  %v857_v3 = vmax.f32 %v793_v15, 0.0 }
 0x14b   :  { %v860_v25 = vmax.f32 %v796_v59, 0.0  ;;  %v862_v0 = vmax.f32 %v798_v23, 0.0  ;;  %v859_v56 = vmax.f32 %v795_v4, 0.0  ;;  %v861_v55 = vmax.f32 %v797_v14, 0.0 }
 0x14c   :  { %v2763_v11 = vpop.permute.xlu1 %993 }
 0x14d   :  { %1059 = vmatprep.subr.mxu0 %v860_v25  ;;  %1220 = vmatprep.subr.mxu1 %v862_v0 }
 0x14e   :  { %1060 = vmatpush1.msra.mxu0 %v859_v56  ;;  %1221 = vmatpush1.msra.mxu1 %v861_v55 }
 0x14f   :  { %1061 = vmatprep.subr.mxu0 %v856_v5  ;;  %1222 = vmatprep.subr.mxu1 %v858_v62  ;;  %v1897_v62 = vmov 1966171168  }
 0x150   :  { %1062 = vmatpush1.msra.mxu0 %v855_v28  ;;  %1223 = vmatpush1.msra.mxu1 %v857_v3  ;;  %v2765_v48 = vpop.permute.xlu1 %1003  ;;  %v2801_v28 = vunpack.c.l.s4 %v1897_v62 }
 0x151   :  { %1096 = vmatmul.mubr.f32.vlgmr.msra.gmra.mxu0 %v919_v47  ;;  %1257 = vmatmul.mubr.f32.vlgmr.msra.gmra.mxu1 %v919_v47 }
 0x152   :  { %1101 = vmatprep.mubr.f32.mxu0 %v2962_v39  ;;  %1262 = vmatprep.mubr.f32.mxu1 %v2962_v39 }
 0x154   :  { %v2767_v51 = vpop.permute.xlu1 %1013 }
 0x155   :  { %1102 = vmatmul.mubr.f32.gmra.mxu0 %v920_v7  ;;  %1263 = vmatmul.mubr.f32.gmra.mxu1 %v920_v7 }
 0x156   :  { %1107 = vmatprep.mubr.f32.mxu0 %v2962_v39  ;;  %1268 = vmatprep.mubr.f32.mxu1 %v2962_v39 }
 0x158   :  { %v2771_v33 = vpop.permute.xlu1 %1023 }
 0x159   :  { %1108 = vmatmul.mubr.f32.gmra.mxu0 %v921_v38  ;;  %1269 = vmatmul.mubr.f32.gmra.mxu1 %v921_v38 }
 0x15a   :  { %1113 = vmatprep.mubr.f32.mxu0 %v2962_v39  ;;  %1274 = vmatprep.mubr.f32.mxu1 %v2962_v39 }
 0x15d   :  { %1114 = vmatmul.mubr.f32.gmra.mxu0 %v922_v42  ;;  %1275 = vmatmul.mubr.f32.gmra.mxu1 %v922_v42  ;;  %v2775_v60 = vpop.permute.xlu1 %1590 }
 0x15e   :  { %1119 = vmatprep.mubr.f32.mxu0 %v2962_v39  ;;  %1280 = vmatprep.mubr.f32.mxu1 %v2962_v39 }
 0x161   :  { %1120 = vmatmul.mubr.f32.gmra.mxu0 %v923_v43  ;;  %1281 = vmatmul.mubr.f32.gmra.mxu1 %v923_v43 }
 0x162   :  { %1125 = vmatprep.mubr.f32.mxu0 %v2962_v39  ;;  %1286 = vmatprep.mubr.f32.mxu1 %v2962_v39 }
 0x165   :  { %1126 = vmatmul.mubr.f32.gmra.mxu0 %v924_v31  ;;  %1287 = vmatmul.mubr.f32.gmra.mxu1 %v924_v31 }
 0x166   :  { %1131 = vmatprep.mubr.f32.mxu0 %v2962_v39  ;;  %1292 = vmatprep.mubr.f32.mxu1 %v2962_v39 }
 0x167   :  { %v2779_v1 = vpop.permute.xlu1 %1598 }
 0x169   :  { %1132 = vmatmul.mubr.f32.gmra.mxu0 %v925_v26  ;;  %1293 = vmatmul.mubr.f32.gmra.mxu1 %v925_v26  ;;  %v2769_v52 = vpop.permute.xlu0 %1594 }
 0x16a   :  { %1137 = vmatprep.mubr.f32.mxu0 %v2962_v39  ;;  %1298 = vmatprep.mubr.f32.mxu1 %v2962_v39 }
 0x16d   :  { %1138 = vmatmul.mubr.f32.gmra.mxu0 %v926_v27  ;;  %1299 = vmatmul.mubr.f32.gmra.mxu1 %v926_v27 }
 0x16e   :  { %1143 = vmatprep.mubr.f32.mxu0 %v2962_v39  ;;  %1304 = vmatprep.mubr.f32.mxu1 %v2962_v39  ;;  %v2773_v35 = vpop.permute.xlu0 %1606 }
 0x171   :  { %1144 = vmatmul.mubr.f32.gmra.mxu0 %v927_v9  ;;  %1305 = vmatmul.mubr.f32.gmra.mxu1 %v927_v9  ;;  %v2783_v8 = vpop.permute.xlu1 %1602 }
 0x172   :  { %1149 = vmatprep.mubr.f32.mxu0 %v2962_v39  ;;  %1310 = vmatprep.mubr.f32.mxu1 %v2962_v39 }
 0x173   :  { %v2777_v54 = vpop.permute.xlu0 %998 }
 0x175   :  { %1150 = vmatmul.mubr.f32.gmra.mxu0 %v928_v40  ;;  %1311 = vmatmul.mubr.f32.gmra.mxu1 %v928_v40  ;;  %v2787_v16 = vpop.permute.xlu1 %1610 }
 0x176   :  { %1155 = vmatprep.mubr.f32.mxu0 %v2962_v39  ;;  %1316 = vmatprep.mubr.f32.mxu1 %v2962_v39 }
 0x177   :  { %v2781_v46 = vpop.permute.xlu0 %1008 }
 0x179   :  { %1156 = vmatmul.mubr.f32.gmra.mxu0 %v929_v10  ;;  %1317 = vmatmul.mubr.f32.gmra.mxu1 %v929_v10 }
 0x17a   :  { %1161 = vmatprep.mubr.f32.mxu0 %v2962_v39  ;;  %1322 = vmatprep.mubr.f32.mxu1 %v2962_v39  ;;  %v959_v45 = vpop.permute.xlu1 %958 }
 0x17b   :  { %v2785_v49 = vpop.permute.xlu0 %1018 }
 0x17d   :  { %1162 = vmatmul.mubr.f32.gmra.mxu0 %v930_v37  ;;  %1323 = vmatmul.mubr.f32.gmra.mxu1 %v930_v37 }
 0x17e   :  { %1167 = vmatprep.mubr.f32.mxu0 %v2962_v39  ;;  %1328 = vmatprep.mubr.f32.mxu1 %v2962_v39 }
 0x17f   :  { %v2789_v17 = vpop.permute.xlu0 %1028 }
 0x180   :  { %v2791_v32 = vpop.permute.xlu1 %1614 }
 0x181   :  { %1168 = vmatmul.mubr.f32.gmra.mxu0 %v931_v57  ;;  %1329 = vmatmul.mubr.f32.gmra.mxu1 %v931_v57 }
 0x182   :  { %1173 = vmatprep.mubr.f32.mxu0 %v2962_v39  ;;  %1334 = vmatprep.mubr.f32.mxu1 %v2962_v39 }
 0x185   :  { %1174 = vmatmul.mubr.f32.gmra.mxu0 %v932_v41  ;;  %1335 = vmatmul.mubr.f32.gmra.mxu1 %v932_v41 }
 0x186   :  { %1179 = vmatprep.mubr.f32.mxu0 %v2962_v39  ;;  %1340 = vmatprep.mubr.f32.mxu1 %v2962_v39 }
 0x187   :  { %v954_v53 = vpop.permute.xlu0 %953  ;;  %v2793_v63 = vpop.permute.xlu1 %1618 }
 0x189   :  { %1180 = vmatmul.mubr.f32.gmra.mxu0 %v933_v19  ;;  %1341 = vmatmul.mubr.f32.gmra.mxu1 %v933_v19 }
 0x18a   :  { %1185 = vmatprep.mubr.f32.mxu0 %v2962_v39  ;;  %1346 = vmatprep.mubr.f32.mxu1 %v2962_v39 }
 0x18b   :  { %v964_v24 = vpop.permute.xlu0 %963 }
 0x18d   :  { %1186 = vmatmul.mubr.f32.gmra.mxu0 %v934_v13  ;;  %1347 = vmatmul.mubr.f32.gmra.mxu1 %v934_v13  ;;  %v1396_v30 = vpop.permute.xlu1 %1395 }
 0x18f   :  { %v2795_v12 = vpop.permute.xlu0 %968 }
 0x191   :  { %v2797_v50 = vpop.permute.xlu1 %973 }
 0x193   :  { %v1401_v61 = vpop.permute.xlu0 %1400 }
 0x195   :  { %v2799_v5 = vpop.permute.xlu1 %978 }
 0x197   :  { %v1406_v23 = vpop.permute.xlu0 %1405 }
 0x211   :  { %v1097_v2 = vpop.f32.mrf.mxu0  ;;  %v1258_v6 = vpop.f32.mrf.mxu1 }
 0x212   :  { %v1098_v29 = vadd.f32 %v1097_v2, %v954_v53  ;;  %v1259_v34 = vadd.f32 %v1258_v6, %v954_v53  ;;  %v1411_v2 = vpop.permute.xlu0 %1410 }
 0x213   :  { %v1099_v58 = vpop.f32.mrf.mxu0  ;;  %v1260_v18 = vpop.f32.mrf.mxu1 }
 0x214   :  { %v1100_v20 = vadd.f32 %v1099_v58, %v954_v53  ;;  %v1361_v21 = vmax.f32 %v1098_v29, 0.0  ;;  %v1261_v44 = vadd.f32 %v1260_v18, %v954_v53  ;;  %v1363_v4 = vmax.f32 %v1259_v34, 0.0 }
 0x215   :  { %v1103_v22 = vpop.f32.mrf.mxu0  ;;  %v1264_v59 = vpop.f32.mrf.mxu1 }
 0x216   :  { %v1362_v14 = vmax.f32 %v1100_v20, 0.0  ;;  %v1104_v36 = vadd.f32 %v1103_v22, %v959_v45  ;;  %v1265_v15 = vadd.f32 %v1264_v59, %v959_v45  ;;  %v1364_v3 = vmax.f32 %v1261_v44, 0.0 }
 0x217   :  { %v1105_v25 = vpop.f32.mrf.mxu0  ;;  %v1266_v0 = vpop.f32.mrf.mxu1  ;;  %v1433_v47 = vmul.f32 %v1396_v30, %v1361_v21  ;;  %v1435_v40 = vmul.f32 %v1396_v30, %v1363_v4 }
 0x218   :  { %v1106_v56 = vadd.f32 %v1105_v25, %v959_v45  ;;  %v1267_v55 = vadd.f32 %v1266_v0, %v959_v45  ;;  %v1365_v39 = vmax.f32 %v1104_v36, 0.0  ;;  %v1367_v7 = vmax.f32 %v1265_v15, 0.0  ;;  %v2803_v4 = vpop.permute.xlu1 %983 }
 0x219   :  { %v1109_v38 = vpop.f32.mrf.mxu0  ;;  %v1270_v42 = vpop.f32.mrf.mxu1  ;;  %v1434_v9 = vmul.f32 %v1396_v30, %v1362_v14  ;;  %v1436_v6 = vmul.f32 %v1396_v30, %v1364_v3 }
 0x21a   :  { %v1366_v43 = vmax.f32 %v1106_v56, 0.0  ;;  %v1368_v31 = vmax.f32 %v1267_v55, 0.0  ;;  %v1110_v26 = vadd.f32 %v1109_v38, %v964_v24  ;;  %v1271_v27 = vadd.f32 %v1270_v42, %v964_v24 }
 0x21b   :  { %v1437_v10 = vmul.f32 %v1401_v61, %v1365_v39  ;;  %v1439_v37 = vmul.f32 %v1401_v61, %v1367_v7  ;;  %v1111_v57 = vpop.f32.mrf.mxu0  ;;  %v1272_v41 = vpop.f32.mrf.mxu1 }
 0x21c   :  { %v1438_v19 = vmul.f32 %v1401_v61, %v1366_v43  ;;  %v1440_v13 = vmul.f32 %v1401_v61, %v1368_v31  ;;  %v1369_v45 = vmax.f32 %v1110_v26, 0.0  ;;  %v1371_v53 = vmax.f32 %v1271_v27, 0.0  ;;  %v1416_v27 = vpop.permute.xlu0 %1415 }
 0x21d   :  { %v1465_v29 = vadd.f32 %v1437_v10, %v1433_v47  ;;  %v1112_v34 = vadd.f32 %v1111_v57, %v964_v24  ;;  %v1273_v58 = vadd.f32 %v1272_v41, %v964_v24  ;;  %v1115_v18 = vpop.f32.mrf.mxu0  ;;  %v1276_v20 = vpop.f32.mrf.mxu1  ;;  %v1491_v44 = vadd.f32 %v1439_v37, %v1435_v40 }
 0x21e   :  { %v1478_v21 = vadd.f32 %v1438_v19, %v1434_v9  ;;  %v1441_v22 = vmul.f32 %v1406_v23, %v1369_v45  ;;  %v1443_v59 = vmul.f32 %v1406_v23, %v1371_v53  ;;  %v1116_v15 = vadd.f32 %v1115_v18, %v2795_v12  ;;  %v989_v45 = vpop.permute.xlu1 %988 }
 0x21f   :  { %v1370_v14 = vmax.f32 %v1112_v34, 0.0  ;;  %v1372_v36 = vmax.f32 %v1273_v58, 0.0  ;;  %v1277_v61 = vadd.f32 %v1276_v20, %v2795_v12  ;;  %v1117_v25 = vpop.f32.mrf.mxu0  ;;  %v1278_v0 = vpop.f32.mrf.mxu1  ;;  %v1504_v30 = vadd.f32 %v1440_v13, %v1436_v6 }
 0x220   :  { %v1466_v56 = vadd.f32 %v1465_v29, %v1441_v22  ;;  %v1118_v24 = vadd.f32 %v1117_v25, %v2795_v12  ;;  %v1279_v55 = vadd.f32 %v1278_v0, %v2795_v12  ;;  %v1373_v47 = vmax.f32 %v1116_v15, 0.0 }
 0x221   :  { %v1442_v62 = vmul.f32 %v1406_v23, %v1370_v14  ;;  %v1444_v3 = vmul.f32 %v1406_v23, %v1372_v36  ;;  %v1375_v39 = vmax.f32 %v1277_v61, 0.0  ;;  %v1121_v7 = vpop.f32.mrf.mxu0  ;;  %v1282_v38 = vpop.f32.mrf.mxu1  ;;  %v1492_v40 = vadd.f32 %v1491_v44, %v1443_v59 }
 0x222   :  { %v1374_v42 = vmax.f32 %v1118_v24, 0.0  ;;  %v1376_v43 = vmax.f32 %v1279_v55, 0.0  ;;  %v1122_v31 = vadd.f32 %v1121_v7, %v2797_v50  ;;  %v1283_v26 = vadd.f32 %v1282_v38, %v2797_v50 }
 0x223   :  { %v1479_v9 = vadd.f32 %v1478_v21, %v1442_v62  ;;  %v1445_v10 = vmul.f32 %v1411_v2, %v1373_v47  ;;  %v1447_v37 = vmul.f32 %v1411_v2, %v1375_v39  ;;  %v1123_v57 = vpop.f32.mrf.mxu0  ;;  %v1284_v41 = vpop.f32.mrf.mxu1  ;;  %v1505_v53 = vadd.f32 %v1504_v30, %v1444_v3 }
 0x224   :  { %v1446_v12 = vmul.f32 %v1411_v2, %v1374_v42  ;;  %v1448_v19 = vmul.f32 %v1411_v2, %v1376_v43  ;;  %v1377_v23 = vmax.f32 %v1122_v31, 0.0  ;;  %v1379_v13 = vmax.f32 %v1283_v26, 0.0  ;;  %v1426_v31 = vpop.permute.xlu1 %1425 }
 0x225   :  { %v1467_v6 = vadd.f32 %v1466_v56, %v1445_v10  ;;  %v1124_v29 = vadd.f32 %v1123_v57, %v2797_v50  ;;  %v1285_v34 = vadd.f32 %v1284_v41, %v2797_v50  ;;  %v1127_v58 = vpop.f32.mrf.mxu0  ;;  %v1288_v18 = vpop.f32.mrf.mxu1  ;;  %v1493_v21 = vadd.f32 %v1492_v40, %v1447_v37 }
 0x226   :  { %v1480_v20 = vadd.f32 %v1479_v9, %v1446_v12  ;;  %v1449_v44 = vmul.f32 %v1416_v27, %v1377_v23  ;;  %v1451_v22 = vmul.f32 %v1416_v27, %v1379_v13  ;;  %v1128_v36 = vadd.f32 %v1127_v58, %v2799_v5  ;;  %v1421_v56 = vpop.permute.xlu0 %1420 }
 0x227   :  { %v1378_v59 = vmax.f32 %v1124_v29, 0.0  ;;  %v1380_v14 = vmax.f32 %v1285_v34, 0.0  ;;  %v1289_v2 = vadd.f32 %v1288_v18, %v2799_v5  ;;  %v1129_v15 = vpop.f32.mrf.mxu0  ;;  %v1290_v61 = vpop.f32.mrf.mxu1  ;;  %v1506_v25 = vadd.f32 %v1505_v53, %v1448_v19 }
 0x228   :  { %v1468_v0 = vadd.f32 %v1467_v6, %v1449_v44  ;;  %v1130_v30 = vadd.f32 %v1129_v15, %v2799_v5  ;;  %v1291_v50 = vadd.f32 %v1290_v61, %v2799_v5  ;;  %v1381_v62 = vmax.f32 %v1128_v36, 0.0 }
 0x229   :  { %v1450_v24 = vmul.f32 %v1416_v27, %v1378_v59  ;;  %v1452_v55 = vmul.f32 %v1416_v27, %v1380_v14  ;;  %v1383_v3 = vmax.f32 %v1289_v2, 0.0  ;;  %v1133_v47 = vpop.f32.mrf.mxu0  ;;  %v1294_v39 = vpop.f32.mrf.mxu1  ;;  %v1494_v9 = vadd.f32 %v1493_v21, %v1451_v22 }
 0x22a   :  { %v1382_v7 = vmax.f32 %v1130_v30, 0.0  ;;  %v1384_v38 = vmax.f32 %v1291_v50, 0.0  ;;  %v1134_v42 = vadd.f32 %v1133_v47, %v2803_v4  ;;  %v1295_v43 = vadd.f32 %v1294_v39, %v2803_v4  ;;  %v1431_v30 = vpop.permute.xlu0 %1430 }
 0x22b   :  { %v1481_v26 = vadd.f32 %v1480_v20, %v1450_v24  ;;  %v1453_v40 = vmul.f32 %v1421_v56, %v1381_v62  ;;  %v1455_v10 = vmul.f32 %v1421_v56, %v1383_v3  ;;  %v1135_v37 = vpop.f32.mrf.mxu0  ;;  %v1296_v5 = vpop.f32.mrf.mxu1  ;;  %v1507_v19 = vadd.f32 %v1506_v25, %v1452_v55 }
 0x22c   :  { %v1454_v57 = vmul.f32 %v1421_v56, %v1382_v7  ;;  %v1456_v41 = vmul.f32 %v1421_v56, %v1384_v38  ;;  %v1385_v27 = vmax.f32 %v1134_v42, 0.0  ;;  %v1387_v12 = vmax.f32 %v1295_v43, 0.0 }
 0x22d   :  { %v1136_v23 = vadd.f32 %v1135_v37, %v2803_v4  ;;  %v1297_v13 = vadd.f32 %v1296_v5, %v2803_v4  ;;  %v1469_v53 = vadd.f32 %v1468_v0, %v1453_v40  ;;  %v1139_v6 = vpop.f32.mrf.mxu0  ;;  %v1300_v29 = vpop.f32.mrf.mxu1  ;;  %v1495_v20 = vadd.f32 %v1494_v9, %v1455_v10 }
 0x22e   :  { %v1457_v34 = vmul.f32 %v1426_v31, %v1385_v27  ;;  %v1459_v58 = vmul.f32 %v1426_v31, %v1387_v12  ;;  %v1482_v18 = vadd.f32 %v1481_v26, %v1454_v57  ;;  %v1140_v22 = vadd.f32 %v1139_v6, %v989_v45 }
 0x22f   :  { %v1386_v21 = vmax.f32 %v1136_v23, 0.0  ;;  %v1388_v44 = vmax.f32 %v1297_v13, 0.0  ;;  %v1301_v59 = vadd.f32 %v1300_v29, %v989_v45  ;;  %v1141_v14 = vpop.f32.mrf.mxu0  ;;  %v1302_v36 = vpop.f32.mrf.mxu1  ;;  %v1508_v15 = vadd.f32 %v1507_v19, %v1456_v41 }
 0x230   :  { %v1470_v2 = vadd.f32 %v1469_v53, %v1457_v34  ;;  %v1142_v61 = vadd.f32 %v1141_v14, %v989_v45  ;;  %v1303_v25 = vadd.f32 %v1302_v36, %v989_v45  ;;  %v1389_v0 = vmax.f32 %v1140_v22, 0.0 }
 0x231   :  { %v1458_v50 = vmul.f32 %v1426_v31, %v1386_v21  ;;  %v1460_v4 = vmul.f32 %v1426_v31, %v1388_v44  ;;  %v1391_v56 = vmax.f32 %v1301_v59, 0.0  ;;  %v1145_v24 = vpop.f32.mrf.mxu0  ;;  %v1306_v55 = vpop.f32.mrf.mxu1  ;;  %v1496_v62 = vadd.f32 %v1495_v20, %v1459_v58 }
 0x232   :  { %v1390_v3 = vmax.f32 %v1142_v61, 0.0  ;;  %v1392_v47 = vmax.f32 %v1303_v25, 0.0  ;;  %v1146_v39 = vadd.f32 %v1145_v24, %v2763_v11  ;;  %v1461_v38 = vmul.f32 %v1431_v30, %v1389_v0 }
 0x233   :  { %v1483_v7 = vadd.f32 %v1482_v18, %v1458_v50  ;;  %v1463_v42 = vmul.f32 %v1431_v30, %v1391_v56  ;;  %v1307_v43 = vadd.f32 %v1306_v55, %v2763_v11  ;;  %v1147_v26 = vpop.f32.mrf.mxu0  ;;  %v1308_v9 = vpop.f32.mrf.mxu1  ;;  %v1509_v45 = vadd.f32 %v1508_v15, %v1460_v4 }
 0x234   :  { %v1462_v40 = vmul.f32 %v1431_v30, %v1390_v3  ;;  %v1464_v10 = vmul.f32 %v1431_v30, %v1392_v47  ;;  %v1148_v31 = vadd.f32 %v1147_v26, %v2763_v11  ;;  %v1531_v37 = vunpack.c.0.s8 %v2801_v28 }
 0x235   :  { %v1471_v5 = vadd.f32 %v1470_v2, %v1461_v38  ;;  %v1497_v57 = vadd.f32 %v1496_v62, %v1463_v42  ;;  %v1309_v41 = vadd.f32 %v1308_v9, %v2763_v11  ;;  %v1151_v27 = vpop.f32.mrf.mxu0  ;;  %v1312_v12 = vpop.f32.mrf.mxu1  ;;  %1806 = vtanh.f32 %v1146_v39 }
 0x236   :  { %v1484_v19 = vadd.f32 %v1483_v7, %v1462_v40  ;;  %v1510_v23 = vadd.f32 %v1509_v45, %v1464_v10  ;;  %v1152_v13 = vadd.f32 %v1151_v27, %v2777_v54  ;;  %1808 = vtanh.f32 %v1307_v43 }
 0x237   :  { %v1472_v53 = vrot.slane %v1471_v5, 4  ;;  %v1498_v6 = vrot.slane %v1497_v57, 4  ;;  %v1313_v29 = vadd.f32 %v1312_v12, %v2777_v54  ;;  %v1153_v34 = vpop.f32.mrf.mxu0  ;;  %v1314_v58 = vpop.f32.mrf.mxu1  ;;  %1810 = vtanh.f32 %v1148_v31 }
 0x238   :  { %v1485_v18 = vrot.slane %v1484_v19, 4  ;;  %v1511_v20 = vrot.slane %v1510_v23, 4  ;;  %v1154_v11 = vadd.f32 %v1153_v34, %v2777_v54  ;;  %1812 = vtanh.f32 %v1309_v41 }
 0x239   :  { %v1473_v21 = vadd.f32 %v1472_v53, %v1471_v5  ;;  %v1499_v44 = vadd.f32 %v1498_v6, %v1497_v57  ;;  %v1315_v22 = vadd.f32 %v1314_v58, %v2777_v54  ;;  %v1157_v59 = vpop.f32.mrf.mxu0  ;;  %v1318_v14 = vpop.f32.mrf.mxu1  ;;  %1814 = vtanh.f32 %v1152_v13  ;;  %v2963_v53 = vld [vmem:[#allocation5_spill] sm:$0xff] }
 0x23a   :  { %v1486_v36 = vadd.f32 %v1485_v18, %v1484_v19  ;;  %v1512_v2 = vadd.f32 %v1511_v20, %v1510_v23  ;;  %v1158_v15 = vadd.f32 %v1157_v59, %v2765_v48  ;;  %1816 = vtanh.f32 %v1313_v29 }
 0x23b   :  { %v1474_v61 = vrot.slane %v1473_v21, 2  ;;  %v1500_v25 = vrot.slane %v1499_v44, 2  ;;  %v1319_v30 = vadd.f32 %v1318_v14, %v2765_v48  ;;  %v1159_v50 = vpop.f32.mrf.mxu0  ;;  %v1320_v4 = vpop.f32.mrf.mxu1  ;;  %1818 = vtanh.f32 %v1154_v11 }
 0x23c   :  { %v1487_v0 = vrot.slane %v1486_v36, 2  ;;  %v1513_v56 = vrot.slane %v1512_v2, 2  ;;  %v1160_v24 = vadd.f32 %v1159_v50, %v2765_v48  ;;  %1820 = vtanh.f32 %v1315_v22 }
 0x23d   :  { %v1475_v54 = vadd.f32 %v1474_v61, %v1473_v21  ;;  %v1501_v55 = vadd.f32 %v1500_v25, %v1499_v44  ;;  %v1321_v62 = vadd.f32 %v1320_v4, %v2765_v48  ;;  %v1163_v3 = vpop.f32.mrf.mxu0  ;;  %v1324_v47 = vpop.f32.mrf.mxu1  ;;  %1822 = vtanh.f32 %v1158_v15 }
 0x23e   :  { %v1488_v39 = vadd.f32 %v1487_v0, %v1486_v36  ;;  %v1514_v7 = vadd.f32 %v1513_v56, %v1512_v2  ;;  %v1164_v38 = vadd.f32 %v1163_v3, %v2781_v46  ;;  %1824 = vtanh.f32 %v1319_v30 }
 0x23f   :  { %v1476_v42 = vrot.slane %v1475_v54, 1  ;;  %v1502_v43 = vrot.slane %v1501_v55, 1  ;;  %v1325_v26 = vadd.f32 %v1324_v47, %v2781_v46  ;;  %v1165_v9 = vpop.f32.mrf.mxu0  ;;  %v1326_v45 = vpop.f32.mrf.mxu1  ;;  %v1518_v40 = vstv %s2828_s3 }
 0x240   :  { %v1489_v10 = vrot.slane %v1488_v39, 1  ;;  %v1515_v31 = vrot.slane %v1514_v7, 1  ;;  %1826 = vtanh.f32 %v1160_v24  ;;  %v1166_v57 = vadd.f32 %v1165_v9, %v2781_v46 }
 0x241   :  { %v1477_v5 = vadd.f32 %v1476_v42, %v1475_v54  ;;  %v1503_v48 = vadd.f32 %v1502_v43, %v1501_v55  ;;  %1828 = vtanh.f32 %v1321_v62  ;;  %v1169_v41 = vpop.f32.mrf.mxu0  ;;  %v1330_v27 = vpop.f32.mrf.mxu1  ;;  %v1327_v23 = vadd.f32 %v1326_v45, %v2781_v46 }
 0x242   :  { %v1490_v12 = vadd.f32 %v1489_v10, %v1488_v39  ;;  %v1516_v19 = vadd.f32 %v1515_v31, %v1514_v7  ;;  %1830 = vtanh.f32 %v1164_v38  ;;  %v2841_v13 = vpop.eup %1806  ;;  %v2846_v6 = vsub.s32 %v1531_v37, %v2963_v53 }
 0x243   :  { %v1519_v29 = vadd.f32 %v1518_v40, %v1477_v5  ;;  %1832 = vtanh.f32 %v1325_v26  ;;  %v1171_v34 = vpop.f32.mrf.mxu0  ;;  %v1332_v58 = vpop.f32.mrf.mxu1  ;;  %v1521_v11 = vadd.f32 %v1518_v40, %v1503_v48  ;;  %v1170_v44 = vadd.f32 %v1169_v41, %v2767_v51 }
 0x244   :  { %v2848_v18 = vpop.eup %1808  ;;  %v1520_v20 = vadd.f32 %v1518_v40, %v1490_v12  ;;  %v1522_v21 = vadd.f32 %v1518_v40, %v1516_v19  ;;  %1834 = vtanh.f32 %v1166_v57  ;;  %v1331_v46 = vadd.f32 %v1330_v27, %v2767_v51 }
 0x245   :  { %v2851_v22 = vpop.eup %1810  ;;  %v1172_v28 = vadd.f32 %v1171_v34, %v2767_v51  ;;  %v1175_v37 = vpop.f32.mrf.mxu0  ;;  %1836 = vtanh.f32 %v1327_v23  ;;  %v1333_v15 = vadd.f32 %v1332_v58, %v2767_v51  ;;  %v2964_v7 = vlaneseq }
 0x246   :  { %v1336_v59 = vpop.f32.mrf.mxu1  ;;  %v2855_v14 = vpop.eup %1812  ;;  %v1527_v36 = vcombine.low %v1519_v29, %v1520_v20  ;;  %v1528_v2 = vcombine.low %v1521_v11, %v1522_v21  ;;  %1838 = vtanh.f32 %v1170_v44  ;;  %v1176_v25 = vadd.f32 %v1175_v37, %v2785_v49 }
 0x247   :  { %v1815_v61 = vpop.eup %1814  ;;  %v1177_v30 = vpop.f32.mrf.mxu0  ;;  %1840 = vtanh.f32 %v1331_v46  ;;  %v1337_v24 = vadd.f32 %v1336_v59, %v2785_v49  ;;  %vm2864_vm0 = vcmp.lt.s32.totalorder %v2964_v7, 512 }
 0x248   :  { %v1338_v50 = vpop.f32.mrf.mxu1  ;;  %v1817_v4 = vpop.eup %1816  ;;  %v1535_v0 = vrot.slane %v1527_v36, %v2846_v6  ;;  %v1542_v56 = vrot.slane %v1528_v2, %v2846_v6  ;;  %1842 = vtanh.f32 %v1172_v28  ;;  %v1178_v55 = vadd.f32 %v1177_v30, %v2785_v49 }
 0x249   :  { %v1819_v54 = vpop.eup %1818  ;;  %v1181_v62 = vpop.f32.mrf.mxu0  ;;  %1844 = vtanh.f32 %v1333_v15  ;;  %v1339_v42 = vadd.f32 %v1338_v50, %v2785_v49  ;;  %v1625_v11 = vmul.f32 %v1815_v61, %v2769_v52  ;;  %v1627_v46 = vmul.f32 %v1817_v4, %v2769_v52 }
 0x24a   :  { %v1342_v51 = vpop.f32.mrf.mxu1  ;;  %v1821_v3 = vpop.eup %1820  ;;  %v1543_v47 = vcombine.low %v1535_v0, %v1542_v56  ;;  %1846 = vtanh.f32 %v1176_v25  ;;  %v1182_v10 = vadd.f32 %v1181_v62, %v2771_v33  ;;  %v1621_v28 = vmul.f32 %v2841_v13, %v2775_v60 }
 0x24b   :  { %v1823_v39 = vpop.eup %1822  ;;  %v1183_v43 = vpop.f32.mrf.mxu0  ;;  %1848 = vtanh.f32 %v1337_v24  ;;  %v1343_v49 = vadd.f32 %v1342_v51, %v2771_v33  ;;  %v1626_v37 = vmul.f32 %v1819_v54, %v2769_v52  ;;  %v1623_v2 = vmul.f32 %v2848_v18, %v2775_v60 }
 0x24c   :  { %v1344_v26 = vpop.f32.mrf.mxu1  ;;  %v1825_v9 = vpop.eup %1824  ;;  %v1550_v45 = vrot.slane %v1543_v47, %v2846_v6  ;;  %1850 = vtanh.f32 %v1178_v55  ;;  %v1184_v41 = vadd.f32 %v1183_v43, %v2771_v33  ;;  %v1629_v59 = vmul.f32 %v1823_v39, %v2779_v1 }
 0x24d   :  { %v1827_v40 = vpop.eup %1826  ;;  %v1187_v31 = vpop.f32.mrf.mxu0  ;;  %1852 = vtanh.f32 %v1339_v42  ;;  %v1345_v19 = vadd.f32 %v1344_v26, %v2771_v33  ;;  %v1628_v15 = vmul.f32 %v1821_v3, %v2769_v52  ;;  %v1622_v25 = vmul.f32 %v2851_v22, %v2775_v60 }
 0x24e   :  { %v1348_v5 = vpop.f32.mrf.mxu1  ;;  %v1829_v48 = vpop.eup %1828  ;;  %1556 = vst.msk [vmem:[%s2934_s7] ss:$2 sm:$0xf] %vm2864_vm0, %v1550_v45  ;;  %1854 = vtanh.f32 %v1182_v10  ;;  %v1188_v53 = vadd.f32 %v1187_v31, %v2789_v17  ;;  %v1653_v30 = vadd.f32 %v1625_v11, %v1621_v28  ;;  %v1630_v13 = vmul.f32 %v1827_v40, %v2779_v1 }
 0x24f   :  { %v1831_v57 = vpop.eup %1830  ;;  %v1189_v27 = vpop.f32.mrf.mxu0  ;;  %1856 = vtanh.f32 %v1343_v49  ;;  %v1349_v34 = vadd.f32 %v1348_v5, %v2789_v17  ;;  %v1624_v0 = vmul.f32 %v2855_v14, %v2775_v60  ;;  %v1679_v56 = vadd.f32 %v1627_v46, %v1623_v2 }
 0x250   :  { %v1833_v12 = vpop.eup %1832  ;;  %v1350_v23 = vpop.f32.mrf.mxu1  ;;  %1858 = vtanh.f32 %v1184_v41  ;;  %v1190_v58 = vadd.f32 %v1189_v27, %v2789_v17  ;;  %v1633_v50 = vmul.f32 %v1831_v57, %v2783_v8  ;;  %v1632_v18 = vmul.f32 %v1829_v48, %v2779_v1 }
 0x251   :  { %v1835_v29 = vpop.eup %1834  ;;  %1860 = vtanh.f32 %v1345_v19  ;;  %v1351_v21 = vadd.f32 %v1350_v23, %v2789_v17  ;;  %v1631_v17 = vmul.f32 %v1825_v9, %v2779_v1  ;;  %v1635_v52 = vmul.f32 %v1833_v12, %v2783_v8 }
 0x252   :  { %v1837_v20 = vpop.eup %1836  ;;  %1862 = vtanh.f32 %v1188_v53  ;;  %v1666_v54 = vadd.f32 %v1626_v37, %v1622_v25  ;;  %v1654_v55 = vadd.f32 %v1653_v30, %v1629_v59  ;;  %v1634_v62 = vmul.f32 %v1835_v29, %v2783_v8 }
 0x253   :  { %v1839_v44 = vpop.eup %1838  ;;  %1864 = vtanh.f32 %v1349_v34  ;;  %v1692_v3 = vadd.f32 %v1628_v15, %v1624_v0  ;;  %v1680_v47 = vadd.f32 %v1679_v56, %v1631_v17  ;;  %v1636_v39 = vmul.f32 %v1837_v20, %v2783_v8 }
 0x254   :  { %v1841_v33 = vpop.eup %1840  ;;  %1866 = vtanh.f32 %v1190_v58  ;;  %v1637_v22 = vmul.f32 %v1839_v44, %v2773_v35  ;;  %v1667_v14 = vadd.f32 %v1666_v54, %v1630_v13  ;;  %v1655_v42 = vadd.f32 %v1654_v55, %v1633_v50 }
 0x255   :  { %v1843_v36 = vpop.eup %1842  ;;  %1868 = vtanh.f32 %v1351_v21  ;;  %v1639_v7 = vmul.f32 %v1841_v33, %v2773_v35  ;;  %v1693_v9 = vadd.f32 %v1692_v3, %v1632_v18  ;;  %v1681_v45 = vadd.f32 %v1680_v47, %v1635_v52 }
 0x256   :  { %v1845_v61 = vpop.eup %1844  ;;  %v1638_v1 = vmul.f32 %v1843_v36, %v2773_v35  ;;  %v1668_v5 = vadd.f32 %v1667_v14, %v1634_v62  ;;  %v1656_v48 = vadd.f32 %v1655_v42, %v1637_v22 }
 0x257   :  { %v1847_v4 = vpop.eup %1846  ;;  %v1640_v40 = vmul.f32 %v1845_v61, %v2773_v35  ;;  %v1694_v41 = vadd.f32 %v1693_v9, %v1636_v39  ;;  %v1682_v27 = vadd.f32 %v1681_v45, %v1639_v7 }
 0x258   :  { %v1849_v24 = vpop.eup %1848  ;;  %v1641_v43 = vmul.f32 %v1847_v4, %v2787_v16  ;;  %v1669_v53 = vadd.f32 %v1668_v5, %v1638_v1 }
 0x259   :  { %v1851_v51 = vpop.eup %1850  ;;  %v1643_v10 = vmul.f32 %v1849_v24, %v2787_v16  ;;  %v1695_v58 = vadd.f32 %v1694_v41, %v1640_v40 }
 0x25a   :  { %v1853_v60 = vpop.eup %1852  ;;  %v1642_v8 = vmul.f32 %v1851_v51, %v2787_v16  ;;  %v1657_v29 = vadd.f32 %v1656_v48, %v1641_v43 }
 0x25b   :  { %v1855_v26 = vpop.eup %1854  ;;  %v1644_v12 = vmul.f32 %v1853_v60, %v2787_v16  ;;  %v1683_v20 = vadd.f32 %v1682_v27, %v1643_v10 }
 0x25c   :  { %v1857_v31 = vpop.eup %1856  ;;  %v1645_v49 = vmul.f32 %v1855_v26, %v2791_v32  ;;  %v1670_v44 = vadd.f32 %v1669_v53, %v1642_v8 }
 0x25d   :  { %v1859_v57 = vpop.eup %1858  ;;  %v1647_v19 = vmul.f32 %v1857_v31, %v2791_v32  ;;  %v1696_v37 = vadd.f32 %v1695_v58, %v1644_v12 }
 0x25e   :  { %v1861_v23 = vpop.eup %1860  ;;  %v1646_v35 = vmul.f32 %v1859_v57, %v2791_v32  ;;  %v1658_v46 = vadd.f32 %v1657_v29, %v1645_v49 }
 0x25f   :  { %v1863_v34 = vpop.eup %1862  ;;  %v1648_v11 = vmul.f32 %v1861_v23, %v2791_v32  ;;  %v1684_v16 = vadd.f32 %v1683_v20, %v1647_v19 }
 0x260   :  { %v1865_v21 = vpop.eup %1864  ;;  %v1649_v33 = vmul.f32 %v1863_v34, %v2793_v63  ;;  %v1671_v2 = vadd.f32 %v1670_v44, %v1646_v35 }
 0x261   :  { %v1867_v28 = vpop.eup %1866  ;;  %v1651_v59 = vmul.f32 %v1865_v21, %v2793_v63  ;;  %v1697_v61 = vadd.f32 %v1696_v37, %v1648_v11 }
 0x262   :  { %v1869_v36 = vpop.eup %1868  ;;  %v1659_v15 = vadd.f32 %v1658_v46, %v1649_v33  ;;  %v1650_v17 = vmul.f32 %v1867_v28, %v2793_v63 }
 0x263   :  { %v1685_v25 = vadd.f32 %v1684_v16, %v1651_v59  ;;  %v1652_v30 = vmul.f32 %v1869_v36, %v2793_v63  ;;  %v1706_v63 = vstv %s1751_s20 }
 0x264   :  { %v1660_v32 = vrot.slane %v1659_v15, 4  ;;  %v1672_v13 = vadd.f32 %v1671_v2, %v1650_v17 }
 0x265   :  { %v1686_v50 = vrot.slane %v1685_v25, 4  ;;  %v1698_v4 = vadd.f32 %v1697_v61, %v1652_v30 }
 0x266   :  { %v1661_v0 = vadd.f32 %v1660_v32, %v1659_v15  ;;  %v1673_v56 = vrot.slane %v1672_v13, 4 }
 0x267   :  { %v1687_v18 = vadd.f32 %v1686_v50, %v1685_v25  ;;  %v1699_v52 = vrot.slane %v1698_v4, 4 }
 0x268   :  { %v1662_v24 = vrot.slane %v1661_v0, 2  ;;  %v1674_v54 = vadd.f32 %v1673_v56, %v1672_v13 }
 0x269   :  { %v1688_v55 = vrot.slane %v1687_v18, 2  ;;  %v1700_v62 = vadd.f32 %v1699_v52, %v1698_v4 }
 0x26a   :  { %v1663_v22 = vadd.f32 %v1662_v24, %v1661_v0  ;;  %v1675_v51 = vrot.slane %v1674_v54, 2 }
 0x26b   :  { %v1689_v3 = vadd.f32 %v1688_v55, %v1687_v18  ;;  %v1701_v47 = vrot.slane %v1700_v62, 2 }
 0x26c   :  { %v1664_v39 = vrot.slane %v1663_v22, 1  ;;  %v1676_v7 = vadd.f32 %v1675_v51, %v1674_v54 }
 0x26d   :  { %v1690_v60 = vrot.slane %v1689_v3, 1  ;;  %v1702_v14 = vadd.f32 %v1701_v47, %v1700_v62 }
 0x26e   :  { %v1665_v42 = vadd.f32 %v1664_v39, %v1663_v22  ;;  %v1677_v1 = vrot.slane %v1676_v7, 1 }
 0x26f   :  { %v1691_v43 = vadd.f32 %v1690_v60, %v1689_v3  ;;  %v1703_v26 = vrot.slane %v1702_v14, 1 }
 0x270   :  { %v1707_v9 = vadd.f32 %v1706_v63, %v1665_v42  ;;  %v1678_v45 = vadd.f32 %v1677_v1, %v1676_v7 }
 0x271   :  { %v1709_v40 = vadd.f32 %v1706_v63, %v1691_v43  ;;  %v1704_v10 = vadd.f32 %v1703_v26, %v1702_v14 }
 0x272   :  { %1870 = vtanh.f32 %v1707_v9  ;;  %v1708_v31 = vadd.f32 %v1706_v63, %v1678_v45 }
 0x273   :  { %1872 = vtanh.f32 %v1709_v40  ;;  %v1710_v5 = vadd.f32 %v1706_v63, %v1704_v10 }
 0x274   :  { %1874 = vtanh.f32 %v1708_v31 }
 0x275   :  { %1876 = vtanh.f32 %v1710_v5 }
 0x27f   :  { %v1871_v48 = vpop.eup %1870 }
 0x280   :  { %v1873_v8 = vpop.eup %1872 }
 0x281   :  { %v1875_v49 = vpop.eup %1874 }
 0x282   :  { %v1877_v57 = vpop.eup %1876  ;;  %v1719_v41 = vcombine.low %v1871_v48, %v1875_v49 }
 0x283   :  { %v1720_v27 = vcombine.low %v1873_v8, %v1877_v57 }
 0x284   :  { %v1727_v12 = vrot.slane %v1719_v41, %v2846_v6 }
 0x285   :  { %v1734_v19 = vrot.slane %v1720_v27, %v2846_v6 }
 0x287   :  { %v1735_v23 = vcombine.low %v1727_v12, %v1734_v19 }
 0x289   :  { %v1742_v53 = vrot.slane %v1735_v23, %v2846_v6 }
 0x28b   :  { %1752 = vst.msk [vmem:[%s2934_s7 + $0x1] ss:$2 sm:$0xf] %vm2864_vm0, %v1742_v53 }
 0x28c   :  { %1750 = vsyncpa [#allocation3], 1 }

</bundles_post_ra>
